<compile_context>
chip_gen: v5e
topology: v5e:2x2
jax: 0.10.0
libtpu: 0.0.40
codegen_flags: <defaults>
</compile_context>

<pallas_src>
import jax
import jax.numpy as jnp
from jax.experimental import pallas as pl
from jax.experimental.pallas import tpu as pltpu


def _round_up(x, m):
    return ((x + m - 1) // m) * m


# Pooled-row tile cap per grid step (=> 4x this many conv-output rows per
# step) and batch-row tile cap for the MLP tail.  Even at the caps the
# double-buffered per-step footprint is only a few MB, far under every
# generation's VMEM (v7x: 64 MiB physical / 32 MiB default scoped).
_TILE_POOLED = 512
_TILE_B = 1024
_VMEM_LIMIT = 32 * 1024 * 1024  # raise v5e's 16 MiB default; safe everywhere


def _pick_tile(m, cap):
    """Row tile: as large as `cap`, but >=2 grid steps when m allows so the
    "parallel" grid axis can shard across v7x's two TensorCores."""
    half = _round_up(max(1, -(-m // 2)), 8)
    tm = max(8, min(cap, half))
    mp = _round_up(m, tm)
    return tm, mp


# ---------------------------------------------------------------------------
# Pallas kernels
# ---------------------------------------------------------------------------
def _conv_tanh_pool_kernel(x_ref, w_ref, b_ref, o_ref):
    """o = avgpool2x2(tanh(conv + b)) for one tile of pooled output rows.

    x_ref: (4, TM, Kp) im2col patches; leading axis = position inside the
           2x2 pool window, TM rows index pooled output positions.
    w_ref: (Kp, Np) flattened conv weights.  b_ref: (1, Np) bias.
    """
    w = w_ref[...]
    b = b_ref[...]
    acc = jnp.tanh(jnp.dot(x_ref[0], w, preferred_element_type=jnp.float32) + b)
    acc = acc + jnp.tanh(jnp.dot(x_ref[1], w, preferred_element_type=jnp.float32) + b)
    acc = acc + jnp.tanh(jnp.dot(x_ref[2], w, preferred_element_type=jnp.float32) + b)
    acc = acc + jnp.tanh(jnp.dot(x_ref[3], w, preferred_element_type=jnp.float32) + b)
    o_ref[...] = acc * 0.25


def _mlp_tail_kernel(x_ref, w3_ref, b3_ref, w4_ref, b4_ref, w5_ref, b5_ref, o_ref):
    """Fused conv3-as-dense -> tanh -> fc4 -> tanh -> fc5.

    All intermediates stay in VMEM/vregs.  Padded LANES remain exactly zero
    through the chain; padded ROWS (beyond B) are garbage and are discarded
    by the caller.
    """
    h = jnp.tanh(jnp.dot(x_ref[...], w3_ref[...],
                         preferred_element_type=jnp.float32) + b3_ref[...])
    h = jnp.tanh(jnp.dot(h, w4_ref[...],
                         preferred_element_type=jnp.float32) + b4_ref[...])
    o_ref[...] = jnp.dot(h, w5_ref[...],
                         preferred_element_type=jnp.float32) + b5_ref[...]


# ---------------------------------------------------------------------------
# Pallas wrappers
# ---------------------------------------------------------------------------
def _conv_tanh_pool(x_nhwc, wmat_p, bias_p, k, pad, n_out):
    """Fused Conv2d(k, stride=1) + Tanh + AvgPool2d(2, 2) on NHWC input."""
    B, H, W, C = x_nhwc.shape
    if pad:
        x_nhwc = jnp.pad(x_nhwc, ((0, 0), (pad, pad), (pad, pad), (0, 0)))
    Ho = H + 2 * pad - k + 1
    Wo = W + 2 * pad - k + 1
    Hp, Wp = Ho // 2, Wo // 2        # pooled spatial dims
    K = C * k * k
    Kp, Np = wmat_p.shape

    # im2col glue (plain JAX): single concatenate -> column order (di, dj, c),
    # matching the (kh, kw, cin) weight flatten in prepare_params().
    cols = [x_nhwc[:, di:di + Ho, dj:dj + Wo, :]
            for di in range(k) for dj in range(k)]
    patches = jnp.concatenate(cols, axis=-1)                  # (B, Ho, Wo, K)
    # Regroup rows: leading axis = 2x2 window position, rows = pooled pos.
    patches = patches.reshape(B, Hp, 2, Wp, 2, K).transpose((2, 4, 0, 1, 3, 5))
    patches = patches.reshape(4, B * Hp * Wp, K)

    M = B * Hp * Wp
    tm, Mp = _pick_tile(M, _TILE_POOLED)
    xp = jnp.pad(patches, ((0, 0), (0, Mp - M), (0, Kp - K)))

    flops = 2 * 4 * Mp * Kp * Np
    trans = 4 * Mp * Np
    bytes_acc = 4 * (4 * Mp * Kp + Kp * Np + Np + Mp * Np)

    out = pl.pallas_call(
        _conv_tanh_pool_kernel,
        out_shape=jax.ShapeDtypeStruct((Mp, Np), jnp.float32),
        grid=(Mp // tm,),
        in_specs=[
            pl.BlockSpec((4, tm, Kp), lambda i: (0, i, 0)),
            pl.BlockSpec((Kp, Np), lambda i: (0, 0)),
            pl.BlockSpec((1, Np), lambda i: (0, 0)),
        ],
        out_specs=pl.BlockSpec((tm, Np), lambda i: (i, 0)),
        compiler_params=pltpu.CompilerParams(
            dimension_semantics=("parallel",),
            vmem_limit_bytes=_VMEM_LIMIT),
        cost_estimate=pl.CostEstimate(flops=flops, transcendentals=trans,
                                      bytes_accessed=bytes_acc),
    )(xp, wmat_p, bias_p)
    # Padded rows are garbage, padded lanes are zero; both discarded here.
    return out[:M, :n_out].reshape(B, Hp, Wp, n_out)


def _mlp_tail(x_flat, pp):
    """Fused conv3(5x5 on 5x5 input == dense 400->120) + fc4 + fc5."""
    B, K = x_flat.shape
    Kp, N3 = pp["w3m"].shape                       # (400, 128)
    No = pp["w5m"].shape[1]                        # 16 (10 valid)
    tb, Bp = _pick_tile(B, _TILE_B)
    xp = jnp.pad(x_flat, ((0, Bp - B), (0, Kp - K)))

    flops = 2 * Bp * (Kp * N3 + N3 * N3 + N3 * No)
    trans = 2 * Bp * N3
    bytes_acc = 4 * (Bp * Kp + Kp * N3 + N3 * N3 + N3 * No
                     + 2 * N3 + No + Bp * No)

    out = pl.pallas_call(
        _mlp_tail_kernel,
        out_shape=jax.ShapeDtypeStruct((Bp, No), jnp.float32),
        grid=(Bp // tb,),
        in_specs=[
            pl.BlockSpec((tb, Kp), lambda i: (i, 0)),
            pl.BlockSpec((Kp, N3), lambda i: (0, 0)),
            pl.BlockSpec((1, N3), lambda i: (0, 0)),
            pl.BlockSpec((N3, N3), lambda i: (0, 0)),
            pl.BlockSpec((1, N3), lambda i: (0, 0)),
            pl.BlockSpec((N3, No), lambda i: (0, 0)),
            pl.BlockSpec((1, No), lambda i: (0, 0)),
        ],
        out_specs=pl.BlockSpec((tb, No), lambda i: (i, 0)),
        compiler_params=pltpu.CompilerParams(
            dimension_semantics=("parallel",),
            vmem_limit_bytes=_VMEM_LIMIT),
        cost_estimate=pl.CostEstimate(flops=flops, transcendentals=trans,
                                      bytes_accessed=bytes_acc),
    )(xp, pp["w3m"], pp["b3p"], pp["w4m"], pp["b4p"], pp["w5m"], pp["b5p"])
    return out[:B, :10]


# ---------------------------------------------------------------------------
# One-time parameter prep: pad + transpose to MXU-friendly tiles.
# Padded lanes / rows of the weight matrices are exactly zero (invariant the
# fused kernels rely on so padded activation LANES stay zero through tanh).
# ---------------------------------------------------------------------------
def prepare_params(p):
    def pad2(m, rp, cp):
        m = m.astype(jnp.float32)
        return jnp.pad(m, ((0, rp - m.shape[0]), (0, cp - m.shape[1])))

    def padb(b, cp):
        b = b.astype(jnp.float32).reshape(1, -1)
        return jnp.pad(b, ((0, 0), (0, cp - b.shape[1])))

    return {
        # conv weights flattened with row order (kh, kw, cin) = patch column
        # order (di, dj, c).  K padded only to the next multiple of 8.
        "w1m": pad2(p["w1"].transpose(2, 3, 1, 0).reshape(25, 6), 32, 8),
        "b1p": padb(p["b1"], 8),
        "w2m": pad2(p["w2"].transpose(2, 3, 1, 0).reshape(150, 16), 152, 16),
        "b2p": padb(p["b2"], 16),
        # conv3 acts on a 5x5x16 input with a 5x5 kernel -> dense 400->120;
        # row order (kh, kw, cin) matches the NHWC flatten of the pooled act.
        "w3m": pad2(p["w3"].transpose(2, 3, 1, 0).reshape(400, 120), 400, 128),
        "b3p": padb(p["b3"], 128),
        "w4m": pad2(p["w4"].T, 128, 128), "b4p": padb(p["b4"], 128),
        "w5m": pad2(p["w5"].T, 128, 16),  "b5p": padb(p["b5"], 16),
    }


# ---------------------------------------------------------------------------
# LeNet-5 forward (3 pallas_calls)
# ---------------------------------------------------------------------------
@jax.jit
def lenet5_forward(x_nchw, pp):
    B = x_nchw.shape[0]
    x = jnp.transpose(x_nchw, (0, 2, 3, 1)).astype(jnp.float32)          # NHWC
    x = _conv_tanh_pool(x, pp["w1m"], pp["b1p"], k=5, pad=2, n_out=6)    # (B,14,14,6)
    x = _conv_tanh_pool(x, pp["w2m"], pp["b2p"], k=5, pad=0, n_out=16)   # (B,5,5,16)
    x = x.reshape(B, 5 * 5 * 16)                                         # (B,400)
    return _mlp_tail(x, pp)                                              # (B,10)


# ---------------------------------------------------------------------------
# Deterministic parameter init (PyTorch-style uniform bounds, OIHW / (out,in))
# ---------------------------------------------------------------------------
def init_params(key):
    ks = jax.random.split(key, 10)

    def u(k, shape, fan_in):
        bound = 1.0 / (fan_in ** 0.5)
        return jax.random.uniform(k, shape, jnp.float32, -bound, bound)

    return {
        "w1": u(ks[0], (6, 1, 5, 5), 1 * 25),     "b1": u(ks[1], (6,), 1 * 25),
        "w2": u(ks[2], (16, 6, 5, 5), 6 * 25),    "b2": u(ks[3], (16,), 6 * 25),
        "w3": u(ks[4], (120, 16, 5, 5), 16 * 25), "b3": u(ks[5], (120,), 16 * 25),
        "w4": u(ks[6], (84, 120), 120),           "b4": u(ks[7], (84,), 120),
        "w5": u(ks[8], (10, 84), 84),             "b5": u(ks[9], (10,), 84),
    }


# ---------------------------------------------------------------------------
# Pure-JAX reference (mirrors the PyTorch module exactly) for verification
# ---------------------------------------------------------------------------
def _avgpool_ref(x_nchw):
    B, C, H, W = x_nchw.shape
    return x_nchw.reshape(B, C, H // 2, 2, W // 2, 2).mean(axis=(3, 5))


def lenet5_reference(x, p):
    dn = ("NCHW", "OIHW", "NCHW")
    x = jax.lax.conv_general_dilated(x, p["w1"], (1, 1), [(2, 2), (2, 2)],
                                     dimension_numbers=dn)
    x = jnp.tanh(x + p["b1"][None, :, None, None])
    x = _avgpool_ref(x)
    x = jax.lax.conv_general_dilated(x, p["w2"], (1, 1), [(0, 0), (0, 0)],
                                     dimension_numbers=dn)
    x = jnp.tanh(x + p["b2"][None, :, None, None])
    x = _avgpool_ref(x)
    x = jax.lax.conv_general_dilated(x, p["w3"], (1, 1), [(0, 0), (0, 0)],
                                     dimension_numbers=dn)
    x = jnp.tanh(x + p["b3"][None, :, None, None])
    x = x.reshape(x.shape[0], 120)
    x = jnp.tanh(x @ p["w4"].T + p["b4"])
    x = x @ p["w5"].T + p["b5"]
    return x


if __name__ == "__main__":
    key = jax.random.PRNGKey(0)
    pkey, xkey = jax.random.split(key)
    params = init_params(pkey)
    pp = prepare_params(params)                      # one-time weight prep
    x = jax.random.normal(xkey, (2, 1, 28, 28), jnp.float32)  # NCHW, MNIST-sized

    out = jax.block_until_ready(lenet5_forward(x, pp))
    ref = lenet5_reference(x, params)

    assert out.shape == (2, 10), out.shape
    assert jnp.allclose(out, ref, atol=1e-4, rtol=1e-4), \
        float(jnp.max(jnp.abs(out - ref)))
    print("KERNEL_OK")
</pallas_src>

<mosaic_0001>
module attributes {stable_mosaic.version = 11 : i64} {
  func.func @_conv_tanh_pool_kernel(%arg0: i32, %arg1: memref<4x200x32xf32, #tpu.memory_space<vmem>>, %arg2: memref<32x8xf32, #tpu.memory_space<vmem>>, %arg3: memref<1x8xf32, #tpu.memory_space<vmem>>, %arg4: memref<200x8xf32, #tpu.memory_space<vmem>>) attributes {dimension_semantics = [#tpu.dimension_semantics<parallel>], iteration_bounds = array<i64: 2>, scalar_prefetch = 0 : i64, scratch_operands = 0 : i64, tpu.core_type = #tpu.core_type<tc>, window_params = [{transform_indices = @transform_0, window_bounds = array<i64: 4, 200, 32>}, {pipeline_mode = #tpu.pipeline_mode<synchronous>, transform_indices = @transform_1, window_bounds = array<i64: 32, 8>}, {pipeline_mode = #tpu.pipeline_mode<synchronous>, transform_indices = @transform_2, window_bounds = array<i64: 1, 8>}, {transform_indices = @transform_3, window_bounds = array<i64: 200, 8>}]} {
    %c0 = arith.constant 0 : index
    %c0_0 = arith.constant 0 : index
    %0 = vector.load %arg2[%c0, %c0_0] : memref<32x8xf32, #tpu.memory_space<vmem>>, vector<32x8xf32>
    %c0_1 = arith.constant 0 : index
    %c0_2 = arith.constant 0 : index
    %1 = vector.load %arg3[%c0_1, %c0_2] : memref<1x8xf32, #tpu.memory_space<vmem>>, vector<1x8xf32>
    %c0_3 = arith.constant 0 : index
    %c0_4 = arith.constant 0 : index
    %c0_5 = arith.constant 0 : index
    %2 = vector.load %arg1[%c0_3, %c0_4, %c0_5] : memref<4x200x32xf32, #tpu.memory_space<vmem>>, vector<1x200x32xf32>
    %3 = vector.shape_cast %2 : vector<1x200x32xf32> to vector<200x32xf32>
    %cst = arith.constant dense<0.000000e+00> : vector<200x8xf32>
    %4 = tpu.matmul %3, %0, %cst {dimension_numbers = #tpu.dot_dimension_numbers<[1], [0], [0], [1], [0, 0, 1, 1], [], []>} : vector<200x32xf32>, vector<32x8xf32>, vector<200x8xf32> -> vector<200x8xf32>
    %5 = vector.broadcast %1 : vector<1x8xf32> to vector<200x8xf32>
    %6 = arith.addf %4, %5 : vector<200x8xf32>
    %7 = math.tanh %6 : vector<200x8xf32>
    %c1 = arith.constant 1 : index
    %c0_6 = arith.constant 0 : index
    %c0_7 = arith.constant 0 : index
    %8 = vector.load %arg1[%c1, %c0_6, %c0_7] : memref<4x200x32xf32, #tpu.memory_space<vmem>>, vector<1x200x32xf32>
    %9 = vector.shape_cast %8 : vector<1x200x32xf32> to vector<200x32xf32>
    %cst_8 = arith.constant dense<0.000000e+00> : vector<200x8xf32>
    %10 = tpu.matmul %9, %0, %cst_8 {dimension_numbers = #tpu.dot_dimension_numbers<[1], [0], [0], [1], [0, 0, 1, 1], [], []>} : vector<200x32xf32>, vector<32x8xf32>, vector<200x8xf32> -> vector<200x8xf32>
    %11 = vector.broadcast %1 : vector<1x8xf32> to vector<200x8xf32>
    %12 = arith.addf %10, %11 : vector<200x8xf32>
    %13 = math.tanh %12 : vector<200x8xf32>
    %14 = arith.addf %7, %13 : vector<200x8xf32>
    %c2 = arith.constant 2 : index
    %c0_9 = arith.constant 0 : index
    %c0_10 = arith.constant 0 : index
    %15 = vector.load %arg1[%c2, %c0_9, %c0_10] : memref<4x200x32xf32, #tpu.memory_space<vmem>>, vector<1x200x32xf32>
    %16 = vector.shape_cast %15 : vector<1x200x32xf32> to vector<200x32xf32>
    %cst_11 = arith.constant dense<0.000000e+00> : vector<200x8xf32>
    %17 = tpu.matmul %16, %0, %cst_11 {dimension_numbers = #tpu.dot_dimension_numbers<[1], [0], [0], [1], [0, 0, 1, 1], [], []>} : vector<200x32xf32>, vector<32x8xf32>, vector<200x8xf32> -> vector<200x8xf32>
    %18 = vector.broadcast %1 : vector<1x8xf32> to vector<200x8xf32>
    %19 = arith.addf %17, %18 : vector<200x8xf32>
    %20 = math.tanh %19 : vector<200x8xf32>
    %21 = arith.addf %14, %20 : vector<200x8xf32>
    %c3 = arith.constant 3 : index
    %c0_12 = arith.constant 0 : index
    %c0_13 = arith.constant 0 : index
    %22 = vector.load %arg1[%c3, %c0_12, %c0_13] : memref<4x200x32xf32, #tpu.memory_space<vmem>>, vector<1x200x32xf32>
    %23 = vector.shape_cast %22 : vector<1x200x32xf32> to vector<200x32xf32>
    %cst_14 = arith.constant dense<0.000000e+00> : vector<200x8xf32>
    %24 = tpu.matmul %23, %0, %cst_14 {dimension_numbers = #tpu.dot_dimension_numbers<[1], [0], [0], [1], [0, 0, 1, 1], [], []>} : vector<200x32xf32>, vector<32x8xf32>, vector<200x8xf32> -> vector<200x8xf32>
    %25 = vector.broadcast %1 : vector<1x8xf32> to vector<200x8xf32>
    %26 = arith.addf %24, %25 : vector<200x8xf32>
    %27 = math.tanh %26 : vector<200x8xf32>
    %28 = arith.addf %21, %27 : vector<200x8xf32>
    %cst_15 = arith.constant 2.500000e-01 : f32
    %29 = vector.broadcast %cst_15 : f32 to vector<200x8xf32>
    %30 = arith.mulf %28, %29 : vector<200x8xf32>
    %c0_16 = arith.constant 0 : index
    %c0_17 = arith.constant 0 : index
    %31 = vector.load %arg4[%c0_16, %c0_17] : memref<200x8xf32, #tpu.memory_space<vmem>>, vector<200x8xf32>
    tpu.vector_store %arg4[%c0_16, %c0_17], %30 {strides = array<i32>} : memref<200x8xf32, #tpu.memory_space<vmem>>, vector<200x8xf32>,
    return
  }
  func.func @transform_0(%arg0: i32) -> (i32, i32, i32) {
    %c0_i32 = arith.constant 0 : i32
    %c0_i32_0 = arith.constant 0 : i32
    %c0_i32_1 = arith.constant 0 : i32
    return %c0_i32, %arg0, %c0_i32_0 : i32, i32, i32
  }
  func.func @transform_1(%arg0: i32) -> (i32, i32) {
    %c0_i32 = arith.constant 0 : i32
    %c0_i32_0 = arith.constant 0 : i32
    %c0_i32_1 = arith.constant 0 : i32
    return %c0_i32, %c0_i32_0 : i32, i32
  }
  func.func @transform_2(%arg0: i32) -> (i32, i32) {
    %c0_i32 = arith.constant 0 : i32
    %c0_i32_0 = arith.constant 0 : i32
    %c0_i32_1 = arith.constant 0 : i32
    return %c0_i32, %c0_i32_0 : i32, i32
  }
  func.func @transform_3(%arg0: i32) -> (i32, i32) {
    %c0_i32 = arith.constant 0 : i32
    %c0_i32_0 = arith.constant 0 : i32
    return %arg0, %c0_i32 : i32, i32
  }
}

module attributes {stable_mosaic.version = 11 : i64} {
  func.func @_conv_tanh_pool_kernel(%arg0: i32, %arg1: memref<4x32x152xf32, #tpu.memory_space<vmem>>, %arg2: memref<152x16xf32, #tpu.memory_space<vmem>>, %arg3: memref<1x16xf32, #tpu.memory_space<vmem>>, %arg4: memref<32x16xf32, #tpu.memory_space<vmem>>) attributes {dimension_semantics = [#tpu.dimension_semantics<parallel>], iteration_bounds = array<i64: 2>, scalar_prefetch = 0 : i64, scratch_operands = 0 : i64, tpu.core_type = #tpu.core_type<tc>, window_params = [{transform_indices = @transform_0, window_bounds = array<i64: 4, 32, 152>}, {pipeline_mode = #tpu.pipeline_mode<synchronous>, transform_indices = @transform_1, window_bounds = array<i64: 152, 16>}, {pipeline_mode = #tpu.pipeline_mode<synchronous>, transform_indices = @transform_2, window_bounds = array<i64: 1, 16>}, {transform_indices = @transform_3, window_bounds = array<i64: 32, 16>}]} {
    %c0 = arith.constant 0 : index
    %c0_0 = arith.constant 0 : index
    %0 = vector.load %arg2[%c0, %c0_0] : memref<152x16xf32, #tpu.memory_space<vmem>>, vector<152x16xf32>
    %c0_1 = arith.constant 0 : index
    %c0_2 = arith.constant 0 : index
    %1 = vector.load %arg3[%c0_1, %c0_2] : memref<1x16xf32, #tpu.memory_space<vmem>>, vector<1x16xf32>
    %c0_3 = arith.constant 0 : index
    %c0_4 = arith.constant 0 : index
    %c0_5 = arith.constant 0 : index
    %2 = vector.load %arg1[%c0_3, %c0_4, %c0_5] : memref<4x32x152xf32, #tpu.memory_space<vmem>>, vector<1x32x152xf32>
    %3 = vector.shape_cast %2 : vector<1x32x152xf32> to vector<32x152xf32>
    %cst = arith.constant dense<0.000000e+00> : vector<32x16xf32>
    %4 = tpu.matmul %3, %0, %cst {dimension_numbers = #tpu.dot_dimension_numbers<[1], [0], [0], [1], [0, 0, 1, 1], [], []>} : vector<32x152xf32>, vector<152x16xf32>, vector<32x16xf32> -> vector<32x16xf32>
    %5 = vector.broadcast %1 : vector<1x16xf32> to vector<32x16xf32>
    %6 = arith.addf %4, %5 : vector<32x16xf32>
    %7 = math.tanh %6 : vector<32x16xf32>
    %c1 = arith.constant 1 : index
    %c0_6 = arith.constant 0 : index
    %c0_7 = arith.constant 0 : index
    %8 = vector.load %arg1[%c1, %c0_6, %c0_7] : memref<4x32x152xf32, #tpu.memory_space<vmem>>, vector<1x32x152xf32>
    %9 = vector.shape_cast %8 : vector<1x32x152xf32> to vector<32x152xf32>
    %cst_8 = arith.constant dense<0.000000e+00> : vector<32x16xf32>
    %10 = tpu.matmul %9, %0, %cst_8 {dimension_numbers = #tpu.dot_dimension_numbers<[1], [0], [0], [1], [0, 0, 1, 1], [], []>} : vector<32x152xf32>, vector<152x16xf32>, vector<32x16xf32> -> vector<32x16xf32>
    %11 = vector.broadcast %1 : vector<1x16xf32> to vector<32x16xf32>
    %12 = arith.addf %10, %11 : vector<32x16xf32>
    %13 = math.tanh %12 : vector<32x16xf32>
    %14 = arith.addf %7, %13 : vector<32x16xf32>
    %c2 = arith.constant 2 : index
    %c0_9 = arith.constant 0 : index
    %c0_10 = arith.constant 0 : index
    %15 = vector.load %arg1[%c2, %c0_9, %c0_10] : memref<4x32x152xf32, #tpu.memory_space<vmem>>, vector<1x32x152xf32>
    %16 = vector.shape_cast %15 : vector<1x32x152xf32> to vector<32x152xf32>
    %cst_11 = arith.constant dense<0.000000e+00> : vector<32x16xf32>
    %17 = tpu.matmul %16, %0, %cst_11 {dimension_numbers = #tpu.dot_dimension_numbers<[1], [0], [0], [1], [0, 0, 1, 1], [], []>} : vector<32x152xf32>, vector<152x16xf32>, vector<32x16xf32> -> vector<32x16xf32>
    %18 = vector.broadcast %1 : vector<1x16xf32> to vector<32x16xf32>
    %19 = arith.addf %17, %18 : vector<32x16xf32>
    %20 = math.tanh %19 : vector<32x16xf32>
    %21 = arith.addf %14, %20 : vector<32x16xf32>
    %c3 = arith.constant 3 : index
    %c0_12 = arith.constant 0 : index
    %c0_13 = arith.constant 0 : index
    %22 = vector.load %arg1[%c3, %c0_12, %c0_13] : memref<4x32x152xf32, #tpu.memory_space<vmem>>, vector<1x32x152xf32>
    %23 = vector.shape_cast %22 : vector<1x32x152xf32> to vector<32x152xf32>
    %cst_14 = arith.constant dense<0.000000e+00> : vector<32x16xf32>
    %24 = tpu.matmul %23, %0, %cst_14 {dimension_numbers = #tpu.dot_dimension_numbers<[1], [0], [0], [1], [0, 0, 1, 1], [], []>} : vector<32x152xf32>, vector<152x16xf32>, vector<32x16xf32> -> vector<32x16xf32>
    %25 = vector.broadcast %1 : vector<1x16xf32> to vector<32x16xf32>
    %26 = arith.addf %24, %25 : vector<32x16xf32>
    %27 = math.tanh %26 : vector<32x16xf32>
    %28 = arith.addf %21, %27 : vector<32x16xf32>
    %cst_15 = arith.constant 2.500000e-01 : f32
    %29 = vector.broadcast %cst_15 : f32 to vector<32x16xf32>
    %30 = arith.mulf %28, %29 : vector<32x16xf32>
    %c0_16 = arith.constant 0 : index
    %c0_17 = arith.constant 0 : index
    %31 = vector.load %arg4[%c0_16, %c0_17] : memref<32x16xf32, #tpu.memory_space<vmem>>, vector<32x16xf32>
    tpu.vector_store %arg4[%c0_16, %c0_17], %30 {strides = array<i32>} : memref<32x16xf32, #tpu.memory_space<vmem>>, vector<32x16xf32>,
    return
  }
  func.func @transform_0(%arg0: i32) -> (i32, i32, i32) {
    %c0_i32 = arith.constant 0 : i32
    %c0_i32_0 = arith.constant 0 : i32
    %c0_i32_1 = arith.constant 0 : i32
    return %c0_i32, %arg0, %c0_i32_0 : i32, i32, i32
  }
  func.func @transform_1(%arg0: i32) -> (i32, i32) {
    %c0_i32 = arith.constant 0 : i32
    %c0_i32_0 = arith.constant 0 : i32
    %c0_i32_1 = arith.constant 0 : i32
    return %c0_i32, %c0_i32_0 : i32, i32
  }
  func.func @transform_2(%arg0: i32) -> (i32, i32) {
    %c0_i32 = arith.constant 0 : i32
    %c0_i32_0 = arith.constant 0 : i32
    %c0_i32_1 = arith.constant 0 : i32
    return %c0_i32, %c0_i32_0 : i32, i32
  }
  func.func @transform_3(%arg0: i32) -> (i32, i32) {
    %c0_i32 = arith.constant 0 : i32
    %c0_i32_0 = arith.constant 0 : i32
    return %arg0, %c0_i32 : i32, i32
  }
}

module attributes {stable_mosaic.version = 11 : i64} {
  func.func @_mlp_tail_kernel(%arg0: i32, %arg1: memref<8x400xf32, #tpu.memory_space<vmem>>, %arg2: memref<400x128xf32, #tpu.memory_space<vmem>>, %arg3: memref<1x128xf32, #tpu.memory_space<vmem>>, %arg4: memref<128x128xf32, #tpu.memory_space<vmem>>, %arg5: memref<1x128xf32, #tpu.memory_space<vmem>>, %arg6: memref<128x16xf32, #tpu.memory_space<vmem>>, %arg7: memref<1x16xf32, #tpu.memory_space<vmem>>, %arg8: memref<8x16xf32, #tpu.memory_space<vmem>>) attributes {dimension_semantics = [#tpu.dimension_semantics<parallel>], iteration_bounds = array<i64: 1>, scalar_prefetch = 0 : i64, scratch_operands = 0 : i64, tpu.core_type = #tpu.core_type<tc>, window_params = [{transform_indices = @transform_0, window_bounds = array<i64: 8, 400>}, {pipeline_mode = #tpu.pipeline_mode<synchronous>, transform_indices = @transform_1, window_bounds = array<i64: 400, 128>}, {pipeline_mode = #tpu.pipeline_mode<synchronous>, transform_indices = @transform_2, window_bounds = array<i64: 1, 128>}, {pipeline_mode = #tpu.pipeline_mode<synchronous>, transform_indices = @transform_3, window_bounds = array<i64: 128, 128>}, {pipeline_mode = #tpu.pipeline_mode<synchronous>, transform_indices = @transform_4, window_bounds = array<i64: 1, 128>}, {pipeline_mode = #tpu.pipeline_mode<synchronous>, transform_indices = @transform_5, window_bounds = array<i64: 128, 16>}, {pipeline_mode = #tpu.pipeline_mode<synchronous>, transform_indices = @transform_6, window_bounds = array<i64: 1, 16>}, {transform_indices = @transform_7, window_bounds = array<i64: 8, 16>}]} {
    %c0 = arith.constant 0 : index
    %c0_0 = arith.constant 0 : index
    %0 = vector.load %arg1[%c0, %c0_0] : memref<8x400xf32, #tpu.memory_space<vmem>>, vector<8x400xf32>
    %c0_1 = arith.constant 0 : index
    %c0_2 = arith.constant 0 : index
    %1 = vector.load %arg2[%c0_1, %c0_2] : memref<400x128xf32, #tpu.memory_space<vmem>>, vector<400x128xf32>
    %cst = arith.constant dense<0.000000e+00> : vector<8x128xf32>
    %2 = tpu.matmul %0, %1, %cst {dimension_numbers = #tpu.dot_dimension_numbers<[1], [0], [0], [1], [0, 0, 1, 1], [], []>} : vector<8x400xf32>, vector<400x128xf32>, vector<8x128xf32> -> vector<8x128xf32>
    %c0_3 = arith.constant 0 : index
    %c0_4 = arith.constant 0 : index
    %3 = vector.load %arg3[%c0_3, %c0_4] : memref<1x128xf32, #tpu.memory_space<vmem>>, vector<1x128xf32>
    %4 = vector.broadcast %3 : vector<1x128xf32> to vector<8x128xf32>
    %5 = arith.addf %2, %4 : vector<8x128xf32>
    %6 = math.tanh %5 : vector<8x128xf32>
    %c0_5 = arith.constant 0 : index
    %c0_6 = arith.constant 0 : index
    %7 = vector.load %arg4[%c0_5, %c0_6] : memref<128x128xf32, #tpu.memory_space<vmem>>, vector<128x128xf32>
    %cst_7 = arith.constant dense<0.000000e+00> : vector<8x128xf32>
    %8 = tpu.matmul %6, %7, %cst_7 {dimension_numbers = #tpu.dot_dimension_numbers<[1], [0], [0], [1], [0, 0, 1, 1], [], []>} : vector<8x128xf32>, vector<128x128xf32>, vector<8x128xf32> -> vector<8x128xf32>
    %c0_8 = arith.constant 0 : index
    %c0_9 = arith.constant 0 : index
    %9 = vector.load %arg5[%c0_8, %c0_9] : memref<1x128xf32, #tpu.memory_space<vmem>>, vector<1x128xf32>
    %10 = vector.broadcast %9 : vector<1x128xf32> to vector<8x128xf32>
    %11 = arith.addf %8, %10 : vector<8x128xf32>
    %12 = math.tanh %11 : vector<8x128xf32>
    %c0_10 = arith.constant 0 : index
    %c0_11 = arith.constant 0 : index
    %13 = vector.load %arg6[%c0_10, %c0_11] : memref<128x16xf32, #tpu.memory_space<vmem>>, vector<128x16xf32>
    %cst_12 = arith.constant dense<0.000000e+00> : vector<8x16xf32>
    %14 = tpu.matmul %12, %13, %cst_12 {dimension_numbers = #tpu.dot_dimension_numbers<[1], [0], [0], [1], [0, 0, 1, 1], [], []>} : vector<8x128xf32>, vector<128x16xf32>, vector<8x16xf32> -> vector<8x16xf32>
    %c0_13 = arith.constant 0 : index
    %c0_14 = arith.constant 0 : index
    %15 = vector.load %arg7[%c0_13, %c0_14] : memref<1x16xf32, #tpu.memory_space<vmem>>, vector<1x16xf32>
    %16 = vector.broadcast %15 : vector<1x16xf32> to vector<8x16xf32>
    %17 = arith.addf %14, %16 : vector<8x16xf32>
    %c0_15 = arith.constant 0 : index
    %c0_16 = arith.constant 0 : index
    %18 = vector.load %arg8[%c0_15, %c0_16] : memref<8x16xf32, #tpu.memory_space<vmem>>, vector<8x16xf32>
    tpu.vector_store %arg8[%c0_15, %c0_16], %17 {strides = array<i32>} : memref<8x16xf32, #tpu.memory_space<vmem>>, vector<8x16xf32>,
    return
  }
  func.func @transform_0(%arg0: i32) -> (i32, i32) {
    %c0_i32 = arith.constant 0 : i32
    %c0_i32_0 = arith.constant 0 : i32
    return %arg0, %c0_i32 : i32, i32
  }
  func.func @transform_1(%arg0: i32) -> (i32, i32) {
    %c0_i32 = arith.constant 0 : i32
    %c0_i32_0 = arith.constant 0 : i32
    %c0_i32_1 = arith.constant 0 : i32
    return %c0_i32, %c0_i32_0 : i32, i32
  }
  func.func @transform_2(%arg0: i32) -> (i32, i32) {
    %c0_i32 = arith.constant 0 : i32
    %c0_i32_0 = arith.constant 0 : i32
    %c0_i32_1 = arith.constant 0 : i32
    return %c0_i32, %c0_i32_0 : i32, i32
  }
  func.func @transform_3(%arg0: i32) -> (i32, i32) {
    %c0_i32 = arith.constant 0 : i32
    %c0_i32_0 = arith.constant 0 : i32
    %c0_i32_1 = arith.constant 0 : i32
    return %c0_i32, %c0_i32_0 : i32, i32
  }
  func.func @transform_4(%arg0: i32) -> (i32, i32) {
    %c0_i32 = arith.constant 0 : i32
    %c0_i32_0 = arith.constant 0 : i32
    %c0_i32_1 = arith.constant 0 : i32
    return %c0_i32, %c0_i32_0 : i32, i32
  }
  func.func @transform_5(%arg0: i32) -> (i32, i32) {
    %c0_i32 = arith.constant 0 : i32
    %c0_i32_0 = arith.constant 0 : i32
    %c0_i32_1 = arith.constant 0 : i32
    return %c0_i32, %c0_i32_0 : i32, i32
  }
  func.func @transform_6(%arg0: i32) -> (i32, i32) {
    %c0_i32 = arith.constant 0 : i32
    %c0_i32_0 = arith.constant 0 : i32
    %c0_i32_1 = arith.constant 0 : i32
    return %c0_i32, %c0_i32_0 : i32, i32
  }
  func.func @transform_7(%arg0: i32) -> (i32, i32) {
    %c0_i32 = arith.constant 0 : i32
    %c0_i32_0 = arith.constant 0 : i32
    return %arg0, %c0_i32 : i32, i32
  }
}

</mosaic_0001>

<bundles_post_ra>
// kernel: lenet5_forward.3
= control target key start
LH: loop header
LB: loop body
LE: loop exit
PB: predicated region body
PF: predicated region fallthrough
CT: control target
= control target key end

     0   :  { %s2130_s12 = smov 0   ;;  %s2132_s13 = smov 0   ;;  %s2763_s0 = inlined_call_operand.vmem [shape: f32[4,400,32], index: 0, kind: input, shape index: {}]   ;;  %s2764_s1 = inlined_call_operand.vmem [shape: f32[32,8], index: 1, kind: input, shape index: {}]   ;;  %s2765_s2 = inlined_call_operand.vmem [shape: f32[1,8], index: 2, kind: input, shape index: {}]   ;;  %s2766_s3 = inlined_call_operand.vmem [shape: f32[400,8], index: 3, kind: output, shape index: {}]  }
   0x1   :  { %s2134_s14 = smov 0  }
   0x2 LB: > { %s1673_s15 = sadd.s32 4294967295, %s2108_s14   ;;  %s2147_s16 = sadd.s32 1, %s2108_s14   ;;  %s2108_s14 = sphi %s2134_s14, %s2769_s14   ;;  %s2104_s13 = sphi %s2132_s13, %s2768_s13   ;;  %s2100_s12 = sphi %s2130_s12, %s2767_s12  }
   0x3   : > { %s17_s17 = ssub.s32 %s2108_s14, %s2147_s16  ;;  %s20_s18 = sadd.s32 1, %s2104_s13 }
   0x4   : > { %p18_p0 = scmp.eq.s32.totalorder %s17_s17, 0  ;;  %p27_p1 = scmp.ne.s32.totalorder %s2104_s13, %s2100_s12 }
   0x5   : > { %p28_p2 = scmp.eq.s32.totalorder %s2108_s14, 0  ;;  %p1676_p4 = scmp.ge.s32.totalorder %s2108_s14, 2 }
   0x6   : > { %s2156_s19 = scalar_select %p18_p0, %s2104_s13, %s20_s18  }
   0x7   : > { %p29_p3 = por %p28_p2, %p27_p1  ;;  %127 = sbr.rel (%p1676_p4) target bundleno = 117 (0x75), region = 24 }
   0xc   : > { %130 = sbr.rel (!%p29_p3) target bundleno = 117 (0x75), region = 28  ;;  %s132_s20 = sand.u32 (%p29_p3), 1, %s2104_s13  }
   0xd   : > { %s1857_s21 = smul.u32 (%p29_p3), 200, %s2108_s14 }
   0xe   : > { %s1858_s22 = smul.u32 (%p29_p3), 800, %s132_s20 }
   0xf   : > { %s2164_s25 = scalar_lea.vmem (%p29_p3), %s2763_s0, %s1857_s21 }
  0x10   : > { %v364_v0 = vld [vmem:[%s2164_s25] sm:$0xff] (%p29_p3)  ;;  %v366_v1 = vld [vmem:[%s2164_s25 + $0x8] sm:$0xff] (%p29_p3)  ;;  %v368_v2 = vld [vmem:[%s2164_s25 + $0x10] sm:$0xff] (%p29_p3)  ;;  %s2169_s26 = scalar_lea.vmem (%p29_p3), [#allocation2], %s1858_s22 }
  0x11   : > { %365 = vst [vmem:[%s2169_s26] sm:$0xff] %v364_v0  ;;  %v370_v3 = vld [vmem:[%s2164_s25 + $0x18] sm:$0xff]  ;;  %v372_v4 = vld [vmem:[%s2164_s25 + $0x20] sm:$0xff]  ;;  %v374_v5 = vld [vmem:[%s2164_s25 + $0x28] sm:$0xff] }
  0x12   : > { %367 = vst [vmem:[%s2169_s26 + $0x8] sm:$0xff] %v366_v1  ;;  %v376_v6 = vld [vmem:[%s2164_s25 + $0x30] sm:$0xff]  ;;  %v378_v7 = vld [vmem:[%s2164_s25 + $0x38] sm:$0xff]  ;;  %v380_v8 = vld [vmem:[%s2164_s25 + $0x40] sm:$0xff] }
  0x13   : > { %369 = vst [vmem:[%s2169_s26 + $0x10] sm:$0xff] %v368_v2  ;;  %v382_v9 = vld [vmem:[%s2164_s25 + $0x48] sm:$0xff]  ;;  %v384_v10 = vld [vmem:[%s2164_s25 + $0x50] sm:$0xff]  ;;  %v386_v11 = vld [vmem:[%s2164_s25 + $0x58] sm:$0xff] }
  0x14   : > { %371 = vst [vmem:[%s2169_s26 + $0x18] sm:$0xff] %v370_v3  ;;  %v388_v12 = vld [vmem:[%s2164_s25 + $0x60] sm:$0xff]  ;;  %v390_v13 = vld [vmem:[%s2164_s25 + $0x68] sm:$0xff]  ;;  %v392_v14 = vld [vmem:[%s2164_s25 + $0x70] sm:$0xff] }
  0x15   : > { %373 = vst [vmem:[%s2169_s26 + $0x20] sm:$0xff] %v372_v4  ;;  %v394_v15 = vld [vmem:[%s2164_s25 + $0x78] sm:$0xff]  ;;  %v396_v16 = vld [vmem:[%s2164_s25 + $0x80] sm:$0xff]  ;;  %v398_v17 = vld [vmem:[%s2164_s25 + $0x88] sm:$0xff] }
  0x16   : > { %375 = vst [vmem:[%s2169_s26 + $0x28] sm:$0xff] %v374_v5  ;;  %v400_v18 = vld [vmem:[%s2164_s25 + $0x90] sm:$0xff]  ;;  %v402_v19 = vld [vmem:[%s2164_s25 + $0x98] sm:$0xff]  ;;  %v404_v20 = vld [vmem:[%s2164_s25 + $0xa0] sm:$0xff] }
  0x17   : > { %377 = vst [vmem:[%s2169_s26 + $0x30] sm:$0xff] %v376_v6  ;;  %v406_v21 = vld [vmem:[%s2164_s25 + $0xa8] sm:$0xff]  ;;  %v408_v22 = vld [vmem:[%s2164_s25 + $0xb0] sm:$0xff]  ;;  %v410_v23 = vld [vmem:[%s2164_s25 + $0xb8] sm:$0xff] }
  0x18   : > { %379 = vst [vmem:[%s2169_s26 + $0x38] sm:$0xff] %v378_v7  ;;  %v412_v24 = vld [vmem:[%s2164_s25 + $0xc0] sm:$0xff]  ;;  %v414_v25 = vld [vmem:[%s2164_s25 + $0x190] sm:$0xff]  ;;  %v416_v26 = vld [vmem:[%s2164_s25 + $0x198] sm:$0xff] }
  0x19   : > { %381 = vst [vmem:[%s2169_s26 + $0x40] sm:$0xff] %v380_v8  ;;  %v418_v27 = vld [vmem:[%s2164_s25 + $0x1a0] sm:$0xff]  ;;  %v420_v28 = vld [vmem:[%s2164_s25 + $0x1a8] sm:$0xff]  ;;  %v422_v29 = vld [vmem:[%s2164_s25 + $0x1b0] sm:$0xff] }
  0x1a   : > { %383 = vst [vmem:[%s2169_s26 + $0x48] sm:$0xff] %v382_v9  ;;  %v424_v30 = vld [vmem:[%s2164_s25 + $0x1b8] sm:$0xff]  ;;  %v426_v31 = vld [vmem:[%s2164_s25 + $0x1c0] sm:$0xff]  ;;  %v428_v32 = vld [vmem:[%s2164_s25 + $0x1c8] sm:$0xff] }
  0x1b   : > { %385 = vst [vmem:[%s2169_s26 + $0x50] sm:$0xff] %v384_v10  ;;  %v430_v33 = vld [vmem:[%s2164_s25 + $0x1d0] sm:$0xff]  ;;  %v432_v34 = vld [vmem:[%s2164_s25 + $0x1d8] sm:$0xff]  ;;  %v434_v35 = vld [vmem:[%s2164_s25 + $0x1e0] sm:$0xff] }
  0x1c   : > { %387 = vst [vmem:[%s2169_s26 + $0x58] sm:$0xff] %v386_v11  ;;  %v436_v36 = vld [vmem:[%s2164_s25 + $0x1e8] sm:$0xff]  ;;  %v438_v37 = vld [vmem:[%s2164_s25 + $0x1f0] sm:$0xff]  ;;  %v440_v38 = vld [vmem:[%s2164_s25 + $0x1f8] sm:$0xff] }
  0x1d   : > { %389 = vst [vmem:[%s2169_s26 + $0x60] sm:$0xff] %v388_v12  ;;  %v442_v39 = vld [vmem:[%s2164_s25 + $0x200] sm:$0xff]  ;;  %v444_v40 = vld [vmem:[%s2164_s25 + $0x208] sm:$0xff]  ;;  %v446_v41 = vld [vmem:[%s2164_s25 + $0x210] sm:$0xff] }
  0x1e   : > { %391 = vst [vmem:[%s2169_s26 + $0x68] sm:$0xff] %v390_v13  ;;  %v448_v42 = vld [vmem:[%s2164_s25 + $0x218] sm:$0xff]  ;;  %v450_v43 = vld [vmem:[%s2164_s25 + $0x220] sm:$0xff]  ;;  %v452_v44 = vld [vmem:[%s2164_s25 + $0x228] sm:$0xff] }
  0x1f   : > { %393 = vst [vmem:[%s2169_s26 + $0x70] sm:$0xff] %v392_v14  ;;  %v454_v45 = vld [vmem:[%s2164_s25 + $0x230] sm:$0xff]  ;;  %v456_v46 = vld [vmem:[%s2164_s25 + $0x238] sm:$0xff]  ;;  %v458_v47 = vld [vmem:[%s2164_s25 + $0x240] sm:$0xff] }
  0x20   : > { %395 = vst [vmem:[%s2169_s26 + $0x78] sm:$0xff] %v394_v15  ;;  %v460_v48 = vld [vmem:[%s2164_s25 + $0x248] sm:$0xff]  ;;  %v462_v49 = vld [vmem:[%s2164_s25 + $0x250] sm:$0xff]  ;;  %v464_v50 = vld [vmem:[%s2164_s25 + $0x320] sm:$0xff] }
  0x21   : > { %397 = vst [vmem:[%s2169_s26 + $0x80] sm:$0xff] %v396_v16  ;;  %v466_v51 = vld [vmem:[%s2164_s25 + $0x328] sm:$0xff]  ;;  %v468_v52 = vld [vmem:[%s2164_s25 + $0x330] sm:$0xff]  ;;  %v470_v53 = vld [vmem:[%s2164_s25 + $0x338] sm:$0xff] }
  0x22   : > { %399 = vst [vmem:[%s2169_s26 + $0x88] sm:$0xff] %v398_v17  ;;  %v472_v54 = vld [vmem:[%s2164_s25 + $0x340] sm:$0xff]  ;;  %v474_v55 = vld [vmem:[%s2164_s25 + $0x348] sm:$0xff]  ;;  %v476_v56 = vld [vmem:[%s2164_s25 + $0x350] sm:$0xff] }
  0x23   : > { %401 = vst [vmem:[%s2169_s26 + $0x90] sm:$0xff] %v400_v18  ;;  %v478_v57 = vld [vmem:[%s2164_s25 + $0x358] sm:$0xff]  ;;  %v480_v58 = vld [vmem:[%s2164_s25 + $0x360] sm:$0xff]  ;;  %v482_v59 = vld [vmem:[%s2164_s25 + $0x368] sm:$0xff] }
  0x24   : > { %403 = vst [vmem:[%s2169_s26 + $0x98] sm:$0xff] %v402_v19  ;;  %v484_v60 = vld [vmem:[%s2164_s25 + $0x370] sm:$0xff]  ;;  %v486_v61 = vld [vmem:[%s2164_s25 + $0x378] sm:$0xff]  ;;  %v488_v62 = vld [vmem:[%s2164_s25 + $0x380] sm:$0xff] }
  0x25   : > { %405 = vst [vmem:[%s2169_s26 + $0xa0] sm:$0xff] %v404_v20  ;;  %v490_v63 = vld [vmem:[%s2164_s25 + $0x388] sm:$0xff]  ;;  %v492_v0 = vld [vmem:[%s2164_s25 + $0x390] sm:$0xff]  ;;  %v494_v1 = vld [vmem:[%s2164_s25 + $0x398] sm:$0xff] }
  0x26   : > { %407 = vst [vmem:[%s2169_s26 + $0xa8] sm:$0xff] %v406_v21  ;;  %v496_v2 = vld [vmem:[%s2164_s25 + $0x3a0] sm:$0xff]  ;;  %v498_v3 = vld [vmem:[%s2164_s25 + $0x3a8] sm:$0xff]  ;;  %v500_v4 = vld [vmem:[%s2164_s25 + $0x3b0] sm:$0xff] }
  0x27   : > { %409 = vst [vmem:[%s2169_s26 + $0xb0] sm:$0xff] %v408_v22  ;;  %v502_v5 = vld [vmem:[%s2164_s25 + $0x3b8] sm:$0xff]  ;;  %v504_v6 = vld [vmem:[%s2164_s25 + $0x3c0] sm:$0xff]  ;;  %v506_v7 = vld [vmem:[%s2164_s25 + $0x3c8] sm:$0xff] }
  0x28   : > { %411 = vst [vmem:[%s2169_s26 + $0xb8] sm:$0xff] %v410_v23  ;;  %v508_v8 = vld [vmem:[%s2164_s25 + $0x3d0] sm:$0xff]  ;;  %v510_v9 = vld [vmem:[%s2164_s25 + $0x3d8] sm:$0xff]  ;;  %v512_v10 = vld [vmem:[%s2164_s25 + $0x3e0] sm:$0xff] }
  0x29   : > { %413 = vst [vmem:[%s2169_s26 + $0xc0] sm:$0xff] %v412_v24  ;;  %v514_v11 = vld [vmem:[%s2164_s25 + $0x4b0] sm:$0xff]  ;;  %v516_v12 = vld [vmem:[%s2164_s25 + $0x4b8] sm:$0xff]  ;;  %v518_v13 = vld [vmem:[%s2164_s25 + $0x4c0] sm:$0xff] }
  0x2a   : > { %415 = vst [vmem:[%s2169_s26 + $0xc8] sm:$0xff] %v414_v25  ;;  %v520_v14 = vld [vmem:[%s2164_s25 + $0x4c8] sm:$0xff]  ;;  %v522_v15 = vld [vmem:[%s2164_s25 + $0x4d0] sm:$0xff]  ;;  %v524_v16 = vld [vmem:[%s2164_s25 + $0x4d8] sm:$0xff] }
  0x2b   : > { %417 = vst [vmem:[%s2169_s26 + $0xd0] sm:$0xff] %v416_v26  ;;  %v526_v17 = vld [vmem:[%s2164_s25 + $0x4e0] sm:$0xff]  ;;  %v528_v18 = vld [vmem:[%s2164_s25 + $0x4e8] sm:$0xff]  ;;  %v530_v19 = vld [vmem:[%s2164_s25 + $0x4f0] sm:$0xff] }
  0x2c   : > { %419 = vst [vmem:[%s2169_s26 + $0xd8] sm:$0xff] %v418_v27  ;;  %v532_v20 = vld [vmem:[%s2164_s25 + $0x4f8] sm:$0xff]  ;;  %v534_v21 = vld [vmem:[%s2164_s25 + $0x500] sm:$0xff]  ;;  %v536_v22 = vld [vmem:[%s2164_s25 + $0x508] sm:$0xff] }
  0x2d   : > { %421 = vst [vmem:[%s2169_s26 + $0xe0] sm:$0xff] %v420_v28  ;;  %v538_v23 = vld [vmem:[%s2164_s25 + $0x510] sm:$0xff]  ;;  %v540_v24 = vld [vmem:[%s2164_s25 + $0x518] sm:$0xff]  ;;  %v542_v25 = vld [vmem:[%s2164_s25 + $0x520] sm:$0xff] }
  0x2e   : > { %423 = vst [vmem:[%s2169_s26 + $0xe8] sm:$0xff] %v422_v29  ;;  %v544_v26 = vld [vmem:[%s2164_s25 + $0x528] sm:$0xff]  ;;  %v546_v27 = vld [vmem:[%s2164_s25 + $0x530] sm:$0xff]  ;;  %v548_v28 = vld [vmem:[%s2164_s25 + $0x538] sm:$0xff] }
  0x2f   : > { %425 = vst [vmem:[%s2169_s26 + $0xf0] sm:$0xff] %v424_v30  ;;  %v550_v29 = vld [vmem:[%s2164_s25 + $0x540] sm:$0xff]  ;;  %v552_v30 = vld [vmem:[%s2164_s25 + $0x548] sm:$0xff] }
  0x30   : > { %427 = vst [vmem:[%s2169_s26 + $0xf8] sm:$0xff] %v426_v31  ;;  %v554_v31 = vld [vmem:[%s2164_s25 + $0x550] sm:$0xff] }
  0x31   : > { %429 = vst [vmem:[%s2169_s26 + $0x100] sm:$0xff] %v428_v32  ;;  %v556_v32 = vld [vmem:[%s2164_s25 + $0x558] sm:$0xff] }
  0x32   : > { %431 = vst [vmem:[%s2169_s26 + $0x108] sm:$0xff] %v430_v33  ;;  %v558_v33 = vld [vmem:[%s2164_s25 + $0x560] sm:$0xff] }
  0x33   : > { %433 = vst [vmem:[%s2169_s26 + $0x110] sm:$0xff] %v432_v34  ;;  %v560_v34 = vld [vmem:[%s2164_s25 + $0x568] sm:$0xff] }
  0x34   : > { %435 = vst [vmem:[%s2169_s26 + $0x118] sm:$0xff] %v434_v35  ;;  %v562_v35 = vld [vmem:[%s2164_s25 + $0x570] sm:$0xff] }
  0x35   : > { %437 = vst [vmem:[%s2169_s26 + $0x120] sm:$0xff] %v436_v36 }
  0x36   : > { %439 = vst [vmem:[%s2169_s26 + $0x128] sm:$0xff] %v438_v37 }
  0x37   : > { %441 = vst [vmem:[%s2169_s26 + $0x130] sm:$0xff] %v440_v38 }
  0x38   : > { %443 = vst [vmem:[%s2169_s26 + $0x138] sm:$0xff] %v442_v39 }
  0x39   : > { %445 = vst [vmem:[%s2169_s26 + $0x140] sm:$0xff] %v444_v40 }
  0x3a   : > { %447 = vst [vmem:[%s2169_s26 + $0x148] sm:$0xff] %v446_v41 }
  0x3b   : > { %449 = vst [vmem:[%s2169_s26 + $0x150] sm:$0xff] %v448_v42 }
  0x3c   : > { %451 = vst [vmem:[%s2169_s26 + $0x158] sm:$0xff] %v450_v43 }
  0x3d   : > { %453 = vst [vmem:[%s2169_s26 + $0x160] sm:$0xff] %v452_v44 }
  0x3e   : > { %455 = vst [vmem:[%s2169_s26 + $0x168] sm:$0xff] %v454_v45 }
  0x3f   : > { %457 = vst [vmem:[%s2169_s26 + $0x170] sm:$0xff] %v456_v46 }
  0x40   : > { %459 = vst [vmem:[%s2169_s26 + $0x178] sm:$0xff] %v458_v47 }
  0x41   : > { %461 = vst [vmem:[%s2169_s26 + $0x180] sm:$0xff] %v460_v48 }
  0x42   : > { %463 = vst [vmem:[%s2169_s26 + $0x188] sm:$0xff] %v462_v49 }
  0x43   : > { %465 = vst [vmem:[%s2169_s26 + $0x190] sm:$0xff] %v464_v50 }
  0x44   : > { %467 = vst [vmem:[%s2169_s26 + $0x198] sm:$0xff] %v466_v51 }
  0x45   : > { %469 = vst [vmem:[%s2169_s26 + $0x1a0] sm:$0xff] %v468_v52 }
  0x46   : > { %471 = vst [vmem:[%s2169_s26 + $0x1a8] sm:$0xff] %v470_v53 }
  0x47   : > { %473 = vst [vmem:[%s2169_s26 + $0x1b0] sm:$0xff] %v472_v54 }
  0x48   : > { %475 = vst [vmem:[%s2169_s26 + $0x1b8] sm:$0xff] %v474_v55 }
  0x49   : > { %477 = vst [vmem:[%s2169_s26 + $0x1c0] sm:$0xff] %v476_v56 }
  0x4a   : > { %479 = vst [vmem:[%s2169_s26 + $0x1c8] sm:$0xff] %v478_v57 }
  0x4b   : > { %481 = vst [vmem:[%s2169_s26 + $0x1d0] sm:$0xff] %v480_v58 }
  0x4c   : > { %483 = vst [vmem:[%s2169_s26 + $0x1d8] sm:$0xff] %v482_v59 }
  0x4d   : > { %485 = vst [vmem:[%s2169_s26 + $0x1e0] sm:$0xff] %v484_v60 }
  0x4e   : > { %487 = vst [vmem:[%s2169_s26 + $0x1e8] sm:$0xff] %v486_v61 }
  0x4f   : > { %489 = vst [vmem:[%s2169_s26 + $0x1f0] sm:$0xff] %v488_v62 }
  0x50   : > { %491 = vst [vmem:[%s2169_s26 + $0x1f8] sm:$0xff] %v490_v63 }
  0x51   : > { %493 = vst [vmem:[%s2169_s26 + $0x200] sm:$0xff] %v492_v0 }
  0x52   : > { %495 = vst [vmem:[%s2169_s26 + $0x208] sm:$0xff] %v494_v1 }
  0x53   : > { %497 = vst [vmem:[%s2169_s26 + $0x210] sm:$0xff] %v496_v2 }
  0x54   : > { %499 = vst [vmem:[%s2169_s26 + $0x218] sm:$0xff] %v498_v3 }
  0x55   : > { %501 = vst [vmem:[%s2169_s26 + $0x220] sm:$0xff] %v500_v4 }
  0x56   : > { %503 = vst [vmem:[%s2169_s26 + $0x228] sm:$0xff] %v502_v5 }
  0x57   : > { %505 = vst [vmem:[%s2169_s26 + $0x230] sm:$0xff] %v504_v6 }
  0x58   : > { %507 = vst [vmem:[%s2169_s26 + $0x238] sm:$0xff] %v506_v7 }
  0x59   : > { %509 = vst [vmem:[%s2169_s26 + $0x240] sm:$0xff] %v508_v8 }
  0x5a   : > { %511 = vst [vmem:[%s2169_s26 + $0x248] sm:$0xff] %v510_v9 }
  0x5b   : > { %513 = vst [vmem:[%s2169_s26 + $0x250] sm:$0xff] %v512_v10 }
  0x5c   : > { %515 = vst [vmem:[%s2169_s26 + $0x258] sm:$0xff] %v514_v11 }
  0x5d   : > { %517 = vst [vmem:[%s2169_s26 + $0x260] sm:$0xff] %v516_v12 }
  0x5e   : > { %519 = vst [vmem:[%s2169_s26 + $0x268] sm:$0xff] %v518_v13 }
  0x5f   : > { %521 = vst [vmem:[%s2169_s26 + $0x270] sm:$0xff] %v520_v14 }
  0x60   : > { %523 = vst [vmem:[%s2169_s26 + $0x278] sm:$0xff] %v522_v15 }
  0x61   : > { %525 = vst [vmem:[%s2169_s26 + $0x280] sm:$0xff] %v524_v16 }
  0x62   : > { %527 = vst [vmem:[%s2169_s26 + $0x288] sm:$0xff] %v526_v17 }
  0x63   : > { %529 = vst [vmem:[%s2169_s26 + $0x290] sm:$0xff] %v528_v18 }
  0x64   : > { %531 = vst [vmem:[%s2169_s26 + $0x298] sm:$0xff] %v530_v19 }
  0x65   : > { %533 = vst [vmem:[%s2169_s26 + $0x2a0] sm:$0xff] %v532_v20 }
  0x66   : > { %535 = vst [vmem:[%s2169_s26 + $0x2a8] sm:$0xff] %v534_v21 }
  0x67   : > { %537 = vst [vmem:[%s2169_s26 + $0x2b0] sm:$0xff] %v536_v22 }
  0x68   : > { %539 = vst [vmem:[%s2169_s26 + $0x2b8] sm:$0xff] %v538_v23 }
  0x69   : > { %541 = vst [vmem:[%s2169_s26 + $0x2c0] sm:$0xff] %v540_v24 }
  0x6a   : > { %543 = vst [vmem:[%s2169_s26 + $0x2c8] sm:$0xff] %v542_v25 }
  0x6b   : > { %545 = vst [vmem:[%s2169_s26 + $0x2d0] sm:$0xff] %v544_v26 }
  0x6c   : > { %547 = vst [vmem:[%s2169_s26 + $0x2d8] sm:$0xff] %v546_v27 }
  0x6d   : > { %549 = vst [vmem:[%s2169_s26 + $0x2e0] sm:$0xff] %v548_v28 }
  0x6e   : > { %551 = vst [vmem:[%s2169_s26 + $0x2e8] sm:$0xff] %v550_v29 }
  0x6f   : > { %553 = vst [vmem:[%s2169_s26 + $0x2f0] sm:$0xff] %v552_v30 }
  0x70   : > { %555 = vst [vmem:[%s2169_s26 + $0x2f8] sm:$0xff] %v554_v31 }
  0x71   : > { %557 = vst [vmem:[%s2169_s26 + $0x300] sm:$0xff] %v556_v32 }
  0x72   : > { %559 = vst [vmem:[%s2169_s26 + $0x308] sm:$0xff] %v558_v33 }
  0x73   : > { %561 = vst [vmem:[%s2169_s26 + $0x310] sm:$0xff] %v560_v34 }
  0x74   : > { %563 = vst [vmem:[%s2169_s26 + $0x318] sm:$0xff] %v562_v35 }
  0x75 PF: > { %p1678_p5 = scmp.ge.s32.totalorder %s2108_s14, 1  ;;  %p568_p6 = scmp.lt.s32.totalorder %s2108_s14, 3 }
  0x77   : > { %p569_p7 = pnand %p1678_p5, %p568_p6 }
  0x78   : > { %s575_s4 = sand.u32 (!%p569_p7), 1, %s2100_s12   ;;  %s599_s17 = smul.u32 (!%p569_p7), 25, %s1673_s15 }
  0x79   : > { %572 = sbr.rel (%p569_p7) target bundleno = 474 (0x1da), region = 66 }
  0x7a   : > { %s1859_s5 = smul.u32 (!%p569_p7), 800, %s575_s4  ;;  %p600_p8 = scmp.lt.s32.totalorder (!%p569_p7), %s599_s17, 49 }
  0x7c   : > { %s2383_s10 = scalar_lea.vmem (!%p569_p7), [#allocation2], %s1859_s5 }
  0x7e   : > { %v608_v36 = vld [vmem:[%s2764_s1 + $0x18] sm:$0xff]  ;;  %v607_v37 = vld [vmem:[%s2764_s1 + $0x10] sm:$0xff]  ;;  %v606_v38 = vld [vmem:[%s2764_s1 + $0x8] sm:$0xff]  ;;  %vm638_vm0 = vcmask 261120   ;;  %s2771_s17 = smov (!%p600_p8, %s599_s17), 49  ;;  %vm1585_vm1 = vcmask 64512  }
  0x7f   : > { %1187 = vmatpush.msra.mxu2 %v608_v36  ;;  %1430 = vmatpush.msra.mxu3 %v608_v36  ;;  %v605_v39 = vld [vmem:[%s2764_s1] sm:$0xff]  ;;  %v1755_v40 = vld [vmem:[%s2383_s10 + $0x190] sm:$0xff]  ;;  %v1805_v41 = vld [vmem:[%s2383_s10 + $0x258] sm:$0xff]  ;;  %s1679_s14 = sshll.u32 %s2771_s17, 3 }
  0x80   : > { %726 = vmatpush.msra.mxu0 %v608_v36  ;;  %944 = vmatpush.msra.mxu1 %v608_v36  ;;  %v610_v42 = vld [vmem:[%s2383_s10] sm:$0xff]  ;;  %v1705_v43 = vld [vmem:[%s2383_s10 + $0xc8] sm:$0xff]  ;;  %v1756_v44 = vld [vmem:[%s2383_s10 + $0x198] sm:$0xff]  ;;  %s2552_s20 = scalar_lea.vmem %s2766_s3, %s1679_s14 }
  0x81   : > { %1188 = vmatpush.msra.mxu2 %v607_v37  ;;  %1431 = vmatpush.msra.mxu3 %v607_v37  ;;  %v1806_v45 = vld [vmem:[%s2383_s10 + $0x260] sm:$0xff]  ;;  %v611_v46 = vld [vmem:[%s2383_s10 + $0x8] sm:$0xff]  ;;  %v1706_v47 = vld [vmem:[%s2383_s10 + $0xd0] sm:$0xff] }
  0x82   : > { %727 = vmatpush.msra.mxu0 %v607_v37  ;;  %945 = vmatpush.msra.mxu1 %v607_v37  ;;  %v1757_v48 = vld [vmem:[%s2383_s10 + $0x1a0] sm:$0xff]  ;;  %v1807_v49 = vld [vmem:[%s2383_s10 + $0x268] sm:$0xff]  ;;  %v612_v50 = vld [vmem:[%s2383_s10 + $0x10] sm:$0xff] }
  0x83   : > { %1189 = vmatpush.msra.mxu2 %v606_v38  ;;  %1432 = vmatpush.msra.mxu3 %v606_v38  ;;  %v1707_v51 = vld [vmem:[%s2383_s10 + $0xd8] sm:$0xff]  ;;  %v1758_v52 = vld [vmem:[%s2383_s10 + $0x1a8] sm:$0xff]  ;;  %v1808_v53 = vld [vmem:[%s2383_s10 + $0x270] sm:$0xff] }
  0x84   : > { %728 = vmatpush.msra.mxu0 %v606_v38  ;;  %946 = vmatpush.msra.mxu1 %v606_v38  ;;  %v613_v54 = vld [vmem:[%s2383_s10 + $0x18] sm:$0xff]  ;;  %v1708_v55 = vld [vmem:[%s2383_s10 + $0xe0] sm:$0xff]  ;;  %v1759_v56 = vld [vmem:[%s2383_s10 + $0x1b0] sm:$0xff] }
  0x85   : > { %1190 = vmatpush.msra.mxu2 %v605_v39  ;;  %1433 = vmatpush.msra.mxu3 %v605_v39  ;;  %v1809_v57 = vld [vmem:[%s2383_s10 + $0x278] sm:$0xff]  ;;  %v614_v58 = vld [vmem:[%s2383_s10 + $0x20] sm:$0xff]  ;;  %v1709_v59 = vld [vmem:[%s2383_s10 + $0xe8] sm:$0xff] }
  0x86   : > { %1780 = vmatmul.msk.f32.vlgmr.msra.gmra.mxu2 %vm638_vm0, %v1755_v40  ;;  %1830 = vmatmul.msk.f32.vlgmr.msra.gmra.mxu3 %vm638_vm0, %v1805_v41  ;;  %v1760_v60 = vld [vmem:[%s2383_s10 + $0x1b8] sm:$0xff]  ;;  %v1810_v61 = vld [vmem:[%s2383_s10 + $0x280] sm:$0xff]  ;;  %v615_v62 = vld [vmem:[%s2383_s10 + $0x28] sm:$0xff] }
  0x87   : > { %729 = vmatpush.msra.mxu0 %v605_v39  ;;  %947 = vmatpush.msra.mxu1 %v605_v39  ;;  %v1710_v63 = vld [vmem:[%s2383_s10 + $0xf0] sm:$0xff]  ;;  %v1761_v0 = vld [vmem:[%s2383_s10 + $0x1c0] sm:$0xff]  ;;  %v1811_v1 = vld [vmem:[%s2383_s10 + $0x288] sm:$0xff] }
  0x88   : > { %1680 = vmatmul.msk.f32.vlgmr.msra.gmra.mxu0 %vm638_vm0, %v610_v42  ;;  %1730 = vmatmul.msk.f32.vlgmr.msra.gmra.mxu1 %vm638_vm0, %v1705_v43  ;;  %v616_v2 = vld [vmem:[%s2383_s10 + $0x30] sm:$0xff]  ;;  %v1711_v3 = vld [vmem:[%s2383_s10 + $0xf8] sm:$0xff]  ;;  %v1762_v4 = vld [vmem:[%s2383_s10 + $0x1c8] sm:$0xff] }
  0x89   : > { %v1812_v5 = vld [vmem:[%s2383_s10 + $0x290] sm:$0xff]  ;;  %v617_v6 = vld [vmem:[%s2383_s10 + $0x38] sm:$0xff]  ;;  %v1712_v7 = vld [vmem:[%s2383_s10 + $0x100] sm:$0xff] }
  0x8a   : > { %v1763_v8 = vld [vmem:[%s2383_s10 + $0x1d0] sm:$0xff]  ;;  %v1813_v9 = vld [vmem:[%s2383_s10 + $0x298] sm:$0xff]  ;;  %v618_v10 = vld [vmem:[%s2383_s10 + $0x40] sm:$0xff] }
  0x8b   : > { %v1713_v11 = vld [vmem:[%s2383_s10 + $0x108] sm:$0xff]  ;;  %v1764_v12 = vld [vmem:[%s2383_s10 + $0x1d8] sm:$0xff]  ;;  %v1814_v13 = vld [vmem:[%s2383_s10 + $0x2a0] sm:$0xff] }
  0x8c   : > { %v619_v14 = vld [vmem:[%s2383_s10 + $0x48] sm:$0xff]  ;;  %v1714_v15 = vld [vmem:[%s2383_s10 + $0x110] sm:$0xff]  ;;  %v1765_v16 = vld [vmem:[%s2383_s10 + $0x1e0] sm:$0xff] }
  0x8d   : > { %v1815_v17 = vld [vmem:[%s2383_s10 + $0x2a8] sm:$0xff]  ;;  %v620_v18 = vld [vmem:[%s2383_s10 + $0x50] sm:$0xff]  ;;  %v1715_v19 = vld [vmem:[%s2383_s10 + $0x118] sm:$0xff] }
  0x8e   : > { %1781 = vmatmul.msk.f32.gmra.mxu2 %vm638_vm0, %v1756_v44  ;;  %1831 = vmatmul.msk.f32.gmra.mxu3 %vm638_vm0, %v1806_v45  ;;  %v1766_v20 = vld [vmem:[%s2383_s10 + $0x1e8] sm:$0xff]  ;;  %v1816_v21 = vld [vmem:[%s2383_s10 + $0x2b0] sm:$0xff]  ;;  %v621_v22 = vld [vmem:[%s2383_s10 + $0x58] sm:$0xff] }
  0x8f   : > { %v1716_v23 = vld [vmem:[%s2383_s10 + $0x120] sm:$0xff]  ;;  %v1767_v24 = vld [vmem:[%s2383_s10 + $0x1f0] sm:$0xff]  ;;  %v1817_v25 = vld [vmem:[%s2383_s10 + $0x2b8] sm:$0xff] }
  0x90   : > { %1681 = vmatmul.msk.f32.gmra.mxu0 %vm638_vm0, %v611_v46  ;;  %1731 = vmatmul.msk.f32.gmra.mxu1 %vm638_vm0, %v1706_v47  ;;  %v622_v26 = vld [vmem:[%s2383_s10 + $0x60] sm:$0xff]  ;;  %v1717_v27 = vld [vmem:[%s2383_s10 + $0x128] sm:$0xff]  ;;  %v1768_v28 = vld [vmem:[%s2383_s10 + $0x1f8] sm:$0xff] }
  0x91   : > { %v1818_v29 = vld [vmem:[%s2383_s10 + $0x2c0] sm:$0xff]  ;;  %v623_v30 = vld [vmem:[%s2383_s10 + $0x68] sm:$0xff]  ;;  %v1718_v31 = vld [vmem:[%s2383_s10 + $0x130] sm:$0xff] }
  0x92   : > { %v1769_v32 = vld [vmem:[%s2383_s10 + $0x200] sm:$0xff]  ;;  %v1819_v33 = vld [vmem:[%s2383_s10 + $0x2c8] sm:$0xff]  ;;  %v624_v34 = vld [vmem:[%s2383_s10 + $0x70] sm:$0xff] }
  0x93   : > { %v1719_v35 = vld [vmem:[%s2383_s10 + $0x138] sm:$0xff]  ;;  %v1770_v36 = vld [vmem:[%s2383_s10 + $0x208] sm:$0xff]  ;;  %v1820_v37 = vld [vmem:[%s2383_s10 + $0x2d0] sm:$0xff] }
  0x94   : > { %v625_v38 = vld [vmem:[%s2383_s10 + $0x78] sm:$0xff]  ;;  %v1720_v39 = vld [vmem:[%s2383_s10 + $0x140] sm:$0xff]  ;;  %v1771_v41 = vld [vmem:[%s2383_s10 + $0x210] sm:$0xff] }
  0x95   : > { %v2516_v40 = vld [vmem:[%s2765_s2] ss:$0 sm:$0xff]  ;;  %v1821_v42 = vld [vmem:[%s2383_s10 + $0x2d8] sm:$0xff]  ;;  %v1721_v46 = vld [vmem:[%s2383_s10 + $0x148] sm:$0xff] }
  0x96   : > { %1782 = vmatmul.msk.f32.gmra.mxu2 %vm638_vm0, %v1757_v48  ;;  %1832 = vmatmul.msk.f32.gmra.mxu3 %vm638_vm0, %v1807_v49  ;;  %v626_v45 = vld [vmem:[%s2383_s10 + $0x80] sm:$0xff] }
  0x98   : > { %1682 = vmatmul.msk.f32.gmra.mxu0 %vm638_vm0, %v612_v50  ;;  %1732 = vmatmul.msk.f32.gmra.mxu1 %vm638_vm0, %v1707_v51 }
  0x9e   : > { %1783 = vmatmul.msk.f32.gmra.mxu2 %vm638_vm0, %v1758_v52  ;;  %1833 = vmatmul.msk.f32.gmra.mxu3 %vm638_vm0, %v1808_v53  ;;  %v1772_v53 = vld [vmem:[%s2383_s10 + $0x218] sm:$0xff] }
  0xa0   : > { %1683 = vmatmul.msk.f32.gmra.mxu0 %vm638_vm0, %v613_v54  ;;  %1733 = vmatmul.msk.f32.gmra.mxu1 %vm638_vm0, %v1708_v55  ;;  %v1822_v54 = vld [vmem:[%s2383_s10 + $0x2e0] sm:$0xff] }
  0xa6   : > { %1784 = vmatmul.msk.f32.gmra.mxu2 %vm638_vm0, %v1759_v56  ;;  %1834 = vmatmul.msk.f32.gmra.mxu3 %vm638_vm0, %v1809_v57  ;;  %v627_v57 = vld [vmem:[%s2383_s10 + $0x88] sm:$0xff] }
  0xa8   : > { %1684 = vmatmul.msk.f32.gmra.mxu0 %vm638_vm0, %v614_v58  ;;  %1734 = vmatmul.msk.f32.gmra.mxu1 %vm638_vm0, %v1709_v59  ;;  %v1722_v58 = vld [vmem:[%s2383_s10 + $0x150] sm:$0xff] }
  0xae   : > { %1785 = vmatmul.msk.f32.gmra.mxu2 %vm638_vm0, %v1760_v60  ;;  %1835 = vmatmul.msk.f32.gmra.mxu3 %vm638_vm0, %v1810_v61 }
  0xb0   : > { %1685 = vmatmul.msk.f32.gmra.mxu0 %vm638_vm0, %v615_v62  ;;  %1735 = vmatmul.msk.f32.gmra.mxu1 %vm638_vm0, %v1710_v63 }
  0xb6   : > { %1786 = vmatmul.msk.f32.gmra.mxu2 %vm638_vm0, %v1761_v0  ;;  %1836 = vmatmul.msk.f32.gmra.mxu3 %vm638_vm0, %v1811_v1 }
  0xb8   : > { %1686 = vmatmul.msk.f32.gmra.mxu0 %vm638_vm0, %v616_v2  ;;  %1736 = vmatmul.msk.f32.gmra.mxu1 %vm638_vm0, %v1711_v3 }
  0xbe   : > { %1787 = vmatmul.msk.f32.gmra.mxu2 %vm638_vm0, %v1762_v4  ;;  %1837 = vmatmul.msk.f32.gmra.mxu3 %vm638_vm0, %v1812_v5 }
  0xc0   : > { %1687 = vmatmul.msk.f32.gmra.mxu0 %vm638_vm0, %v617_v6  ;;  %1737 = vmatmul.msk.f32.gmra.mxu1 %vm638_vm0, %v1712_v7  ;;  %v1773_v7 = vld [vmem:[%s2383_s10 + $0x220] sm:$0xff] }
  0xc6   : > { %1788 = vmatmul.msk.f32.gmra.mxu2 %vm638_vm0, %v1763_v8  ;;  %1838 = vmatmul.msk.f32.gmra.mxu3 %vm638_vm0, %v1813_v9  ;;  %v1823_v8 = vld [vmem:[%s2383_s10 + $0x2e8] sm:$0xff] }
  0xc8   : > { %1688 = vmatmul.msk.f32.gmra.mxu0 %vm638_vm0, %v618_v10  ;;  %1738 = vmatmul.msk.f32.gmra.mxu1 %vm638_vm0, %v1713_v11 }
  0xce   : > { %1789 = vmatmul.msk.f32.gmra.mxu2 %vm638_vm0, %v1764_v12  ;;  %1839 = vmatmul.msk.f32.gmra.mxu3 %vm638_vm0, %v1814_v13  ;;  %v628_v12 = vld [vmem:[%s2383_s10 + $0x90] sm:$0xff]  ;;  %v1723_v13 = vld [vmem:[%s2383_s10 + $0x158] sm:$0xff] }
  0xd0   : > { %1689 = vmatmul.msk.f32.gmra.mxu0 %vm638_vm0, %v619_v14  ;;  %1739 = vmatmul.msk.f32.gmra.mxu1 %vm638_vm0, %v1714_v15 }
  0xd6   : > { %1790 = vmatmul.msk.f32.gmra.mxu2 %vm638_vm0, %v1765_v16  ;;  %1840 = vmatmul.msk.f32.gmra.mxu3 %vm638_vm0, %v1815_v17 }
  0xd8   : > { %1690 = vmatmul.msk.f32.gmra.mxu0 %vm638_vm0, %v620_v18  ;;  %1740 = vmatmul.msk.f32.gmra.mxu1 %vm638_vm0, %v1715_v19 }
  0xde   : > { %1791 = vmatmul.msk.f32.gmra.mxu2 %vm638_vm0, %v1766_v20  ;;  %1841 = vmatmul.msk.f32.gmra.mxu3 %vm638_vm0, %v1816_v21 }
  0xe0   : > { %1691 = vmatmul.msk.f32.gmra.mxu0 %vm638_vm0, %v621_v22  ;;  %1741 = vmatmul.msk.f32.gmra.mxu1 %vm638_vm0, %v1716_v23 }
  0xe6   : > { %1792 = vmatmul.msk.f32.gmra.mxu2 %vm638_vm0, %v1767_v24  ;;  %1842 = vmatmul.msk.f32.gmra.mxu3 %vm638_vm0, %v1817_v25 }
  0xe8   : > { %1692 = vmatmul.msk.f32.gmra.mxu0 %vm638_vm0, %v622_v26  ;;  %1742 = vmatmul.msk.f32.gmra.mxu1 %vm638_vm0, %v1717_v27  ;;  %v1774_v27 = vld [vmem:[%s2383_s10 + $0x228] sm:$0xff] }
  0xee   : > { %1793 = vmatmul.msk.f32.gmra.mxu2 %vm638_vm0, %v1768_v28  ;;  %1843 = vmatmul.msk.f32.gmra.mxu3 %vm638_vm0, %v1818_v29  ;;  %v1824_v28 = vld [vmem:[%s2383_s10 + $0x2f0] sm:$0xff] }
  0xf0   : > { %1693 = vmatmul.msk.f32.gmra.mxu0 %vm638_vm0, %v623_v30  ;;  %1743 = vmatmul.msk.f32.gmra.mxu1 %vm638_vm0, %v1718_v31 }
  0xf6   : > { %1794 = vmatmul.msk.f32.gmra.mxu2 %vm638_vm0, %v1769_v32  ;;  %1844 = vmatmul.msk.f32.gmra.mxu3 %vm638_vm0, %v1819_v33  ;;  %v629_v32 = vld [vmem:[%s2383_s10 + $0x98] sm:$0xff]  ;;  %v1724_v33 = vld [vmem:[%s2383_s10 + $0x160] sm:$0xff] }
  0xf8   : > { %1694 = vmatmul.msk.f32.gmra.mxu0 %vm638_vm0, %v624_v34  ;;  %1744 = vmatmul.msk.f32.gmra.mxu1 %vm638_vm0, %v1719_v35 }
  0xfe   : > { %1795 = vmatmul.msk.f32.gmra.mxu2 %vm638_vm0, %v1770_v36  ;;  %1845 = vmatmul.msk.f32.gmra.mxu3 %vm638_vm0, %v1820_v37 }
 0x100   : > { %1695 = vmatmul.msk.f32.gmra.mxu0 %vm638_vm0, %v625_v38  ;;  %1745 = vmatmul.msk.f32.gmra.mxu1 %vm638_vm0, %v1720_v39 }
 0x105   : > { %v731_v43 = vpop.f32.mrf.mxu0  ;;  %v949_v44 = vpop.f32.mrf.mxu1 }
 0x106   : > { %1796 = vmatmul.msk.f32.gmra.mxu2 %vm638_vm0, %v1771_v41  ;;  %v732_v47 = vadd.f32 %v2516_v40, %v731_v43  ;;  %v950_v48 = vadd.f32 %v2516_v40, %v949_v44  ;;  %1846 = vmatmul.msk.f32.gmra.mxu3 %vm638_vm0, %v1821_v42 }
 0x108   : > { %1885 = vtanh.f32 %v732_v47  ;;  %1696 = vmatmul.msk.f32.gmra.mxu0 %vm638_vm0, %v626_v45  ;;  %1746 = vmatmul.msk.f32.gmra.mxu1 %vm638_vm0, %v1721_v46 }
 0x109   : > { %1887 = vtanh.f32 %v950_v48  ;;  %v1192_v49 = vpop.f32.mrf.mxu2  ;;  %v1435_v50 = vpop.f32.mrf.mxu3  ;;  %v1775_v48 = vld [vmem:[%s2383_s10 + $0x230] sm:$0xff] }
 0x10a   : > { %v1193_v51 = vadd.f32 %v2516_v40, %v1192_v49  ;;  %v1436_v52 = vadd.f32 %v2516_v40, %v1435_v50  ;;  %v1825_v49 = vld [vmem:[%s2383_s10 + $0x2f8] sm:$0xff] }
 0x10c   : > { %1889 = vtanh.f32 %v1193_v51 }
 0x10d   : > { %1891 = vtanh.f32 %v1436_v52  ;;  %v734_v55 = vpop.f32.mrf.mxu0  ;;  %v952_v56 = vpop.f32.mrf.mxu1 }
 0x10e   : > { %v1886_v59 = vpop.eup %1885  ;;  %1797 = vmatmul.msk.f32.gmra.mxu2 %vm638_vm0, %v1772_v53  ;;  %v735_v60 = vadd.f32 %v2516_v40, %v734_v55  ;;  %v953_v61 = vadd.f32 %v2516_v40, %v952_v56  ;;  %1847 = vmatmul.msk.f32.gmra.mxu3 %vm638_vm0, %v1822_v54  ;;  %v630_v53 = vld [vmem:[%s2383_s10 + $0xa0] sm:$0xff]  ;;  %v1725_v54 = vld [vmem:[%s2383_s10 + $0x168] sm:$0xff] }
 0x10f   : > { %v1888_v62 = vpop.eup %1887 }
 0x110   : > { %v1049_v63 = vadd.f32 %v1888_v62, %v1886_v59  ;;  %1893 = vtanh.f32 %v735_v60  ;;  %1697 = vmatmul.msk.f32.gmra.mxu0 %vm638_vm0, %v627_v57  ;;  %1747 = vmatmul.msk.f32.gmra.mxu1 %vm638_vm0, %v1722_v58 }
 0x111   : > { %1895 = vtanh.f32 %v953_v61  ;;  %v1195_v0 = vpop.f32.mrf.mxu2  ;;  %v1438_v1 = vpop.f32.mrf.mxu3 }
 0x112   : > { %v1890_v2 = vpop.eup %1889  ;;  %v1196_v3 = vadd.f32 %v2516_v40, %v1195_v0  ;;  %v1439_v4 = vadd.f32 %v2516_v40, %v1438_v1 }
 0x113   : > { %v1892_v5 = vpop.eup %1891  ;;  %v1292_v6 = vadd.f32 %v1890_v2, %v1049_v63 }
 0x114   : > { %1897 = vtanh.f32 %v1196_v3 }
 0x115   : > { %v1535_v9 = vadd.f32 %v1892_v5, %v1292_v6  ;;  %1899 = vtanh.f32 %v1439_v4  ;;  %v737_v10 = vpop.f32.mrf.mxu0  ;;  %v955_v11 = vpop.f32.mrf.mxu1  ;;  %v1776_v4 = vld [vmem:[%s2383_s10 + $0x238] sm:$0xff]  ;;  %v1826_v5 = vld [vmem:[%s2383_s10 + $0x300] sm:$0xff] }
 0x116   : > { %v1894_v14 = vpop.eup %1893  ;;  %1798 = vmatmul.msk.f32.gmra.mxu2 %vm638_vm0, %v1773_v7  ;;  %v738_v15 = vadd.f32 %v2516_v40, %v737_v10  ;;  %v956_v16 = vadd.f32 %v2516_v40, %v955_v11  ;;  %1848 = vmatmul.msk.f32.gmra.mxu3 %vm638_vm0, %v1823_v8  ;;  %v1726_v10 = vld [vmem:[%s2383_s10 + $0x170] sm:$0xff] }
 0x117   : > { %v1896_v17 = vpop.eup %1895  ;;  %v1560_v18 = vmul.f32 0.25, %v1535_v9  ;;  %v631_v9 = vld [vmem:[%s2383_s10 + $0xa8] sm:$0xff] }
 0x118   : > { %v1050_v19 = vadd.f32 %v1896_v17, %v1894_v14  ;;  %1901 = vtanh.f32 %v738_v15  ;;  %1698 = vmatmul.msk.f32.gmra.mxu0 %vm638_vm0, %v628_v12  ;;  %1748 = vmatmul.msk.f32.gmra.mxu1 %vm638_vm0, %v1723_v13 }
 0x119   : > { %1586 = vst.msk [vmem:[%s2552_s20] sm:$0xff] %vm1585_vm1, %v1560_v18  ;;  %1903 = vtanh.f32 %v956_v16  ;;  %v1198_v20 = vpop.f32.mrf.mxu2  ;;  %v1441_v21 = vpop.f32.mrf.mxu3 }
 0x11a   : > { %v1898_v22 = vpop.eup %1897  ;;  %v1199_v23 = vadd.f32 %v2516_v40, %v1198_v20  ;;  %v1442_v24 = vadd.f32 %v2516_v40, %v1441_v21 }
 0x11b   : > { %v1900_v25 = vpop.eup %1899  ;;  %v1293_v26 = vadd.f32 %v1898_v22, %v1050_v19 }
 0x11c   : > { %1905 = vtanh.f32 %v1199_v23 }
 0x11d   : > { %v1536_v29 = vadd.f32 %v1900_v25, %v1293_v26  ;;  %1907 = vtanh.f32 %v1442_v24  ;;  %v740_v30 = vpop.f32.mrf.mxu0  ;;  %v958_v31 = vpop.f32.mrf.mxu1  ;;  %v1777_v24 = vld [vmem:[%s2383_s10 + $0x240] sm:$0xff]  ;;  %v1827_v25 = vld [vmem:[%s2383_s10 + $0x308] sm:$0xff] }
 0x11e   : > { %v1902_v34 = vpop.eup %1901  ;;  %1799 = vmatmul.msk.f32.gmra.mxu2 %vm638_vm0, %v1774_v27  ;;  %v741_v35 = vadd.f32 %v2516_v40, %v740_v30  ;;  %v959_v36 = vadd.f32 %v2516_v40, %v958_v31  ;;  %1849 = vmatmul.msk.f32.gmra.mxu3 %vm638_vm0, %v1824_v28  ;;  %v1727_v30 = vld [vmem:[%s2383_s10 + $0x178] sm:$0xff] }
 0x11f   : > { %v1904_v37 = vpop.eup %1903  ;;  %v1561_v38 = vmul.f32 0.25, %v1536_v29  ;;  %v632_v29 = vld [vmem:[%s2383_s10 + $0xb0] sm:$0xff] }
 0x120   : > { %v1051_v39 = vadd.f32 %v1904_v37, %v1902_v34  ;;  %1909 = vtanh.f32 %v741_v35  ;;  %1699 = vmatmul.msk.f32.gmra.mxu0 %vm638_vm0, %v629_v32  ;;  %1749 = vmatmul.msk.f32.gmra.mxu1 %vm638_vm0, %v1724_v33 }
 0x121   : > { %1587 = vst.msk [vmem:[%s2552_s20 + $0x8] sm:$0xff] %vm1585_vm1, %v1561_v38  ;;  %1911 = vtanh.f32 %v959_v36  ;;  %v1201_v41 = vpop.f32.mrf.mxu2  ;;  %v1444_v42 = vpop.f32.mrf.mxu3 }
 0x122   : > { %v1906_v43 = vpop.eup %1905  ;;  %v1202_v44 = vadd.f32 %v2516_v40, %v1201_v41  ;;  %v1445_v45 = vadd.f32 %v2516_v40, %v1444_v42 }
 0x123   : > { %v1908_v46 = vpop.eup %1907  ;;  %v1294_v47 = vadd.f32 %v1906_v43, %v1051_v39 }
 0x124   : > { %1913 = vtanh.f32 %v1202_v44 }
 0x125   : > { %v1537_v50 = vadd.f32 %v1908_v46, %v1294_v47  ;;  %1915 = vtanh.f32 %v1445_v45  ;;  %v743_v51 = vpop.f32.mrf.mxu0  ;;  %v961_v52 = vpop.f32.mrf.mxu1  ;;  %v1778_v45 = vld [vmem:[%s2383_s10 + $0x248] sm:$0xff]  ;;  %v1828_v46 = vld [vmem:[%s2383_s10 + $0x310] sm:$0xff] }
 0x126   : > { %v1910_v55 = vpop.eup %1909  ;;  %1800 = vmatmul.msk.f32.gmra.mxu2 %vm638_vm0, %v1775_v48  ;;  %v744_v56 = vadd.f32 %v2516_v40, %v743_v51  ;;  %v962_v57 = vadd.f32 %v2516_v40, %v961_v52  ;;  %1850 = vmatmul.msk.f32.gmra.mxu3 %vm638_vm0, %v1825_v49  ;;  %v1728_v51 = vld [vmem:[%s2383_s10 + $0x180] sm:$0xff] }
 0x127   : > { %v1912_v58 = vpop.eup %1911  ;;  %v1562_v59 = vmul.f32 0.25, %v1537_v50  ;;  %v633_v50 = vld [vmem:[%s2383_s10 + $0xb8] sm:$0xff] }
 0x128   : > { %v1052_v60 = vadd.f32 %v1912_v58, %v1910_v55  ;;  %1917 = vtanh.f32 %v744_v56  ;;  %1700 = vmatmul.msk.f32.gmra.mxu0 %vm638_vm0, %v630_v53  ;;  %1750 = vmatmul.msk.f32.gmra.mxu1 %vm638_vm0, %v1725_v54 }
 0x129   : > { %1588 = vst.msk [vmem:[%s2552_s20 + $0x10] sm:$0xff] %vm1585_vm1, %v1562_v59  ;;  %1919 = vtanh.f32 %v962_v57  ;;  %v1204_v61 = vpop.f32.mrf.mxu2  ;;  %v1447_v62 = vpop.f32.mrf.mxu3 }
 0x12a   : > { %v1914_v63 = vpop.eup %1913  ;;  %v1205_v0 = vadd.f32 %v2516_v40, %v1204_v61  ;;  %v1448_v1 = vadd.f32 %v2516_v40, %v1447_v62 }
 0x12b   : > { %v1916_v2 = vpop.eup %1915  ;;  %v1295_v3 = vadd.f32 %v1914_v63, %v1052_v60 }
 0x12c   : > { %1921 = vtanh.f32 %v1205_v0 }
 0x12d   : > { %v1538_v6 = vadd.f32 %v1916_v2, %v1295_v3  ;;  %1923 = vtanh.f32 %v1448_v1  ;;  %v746_v7 = vpop.f32.mrf.mxu0  ;;  %v964_v8 = vpop.f32.mrf.mxu1  ;;  %v1779_v1 = vld [vmem:[%s2383_s10 + $0x250] sm:$0xff]  ;;  %v1829_v2 = vld [vmem:[%s2383_s10 + $0x318] sm:$0xff] }
 0x12e   : > { %v1918_v11 = vpop.eup %1917  ;;  %1801 = vmatmul.msk.f32.gmra.mxu2 %vm638_vm0, %v1776_v4  ;;  %v747_v12 = vadd.f32 %v2516_v40, %v746_v7  ;;  %v965_v13 = vadd.f32 %v2516_v40, %v964_v8  ;;  %1851 = vmatmul.msk.f32.gmra.mxu3 %vm638_vm0, %v1826_v5  ;;  %v1729_v7 = vld [vmem:[%s2383_s10 + $0x188] sm:$0xff] }
 0x12f   : > { %v1920_v14 = vpop.eup %1919  ;;  %v1563_v15 = vmul.f32 0.25, %v1538_v6  ;;  %v634_v6 = vld [vmem:[%s2383_s10 + $0xc0] sm:$0xff] }
 0x130   : > { %v1053_v16 = vadd.f32 %v1920_v14, %v1918_v11  ;;  %1925 = vtanh.f32 %v747_v12  ;;  %1701 = vmatmul.msk.f32.gmra.mxu0 %vm638_vm0, %v631_v9  ;;  %1751 = vmatmul.msk.f32.gmra.mxu1 %vm638_vm0, %v1726_v10 }
 0x131   : > { %1589 = vst.msk [vmem:[%s2552_s20 + $0x18] sm:$0xff] %vm1585_vm1, %v1563_v15  ;;  %1927 = vtanh.f32 %v965_v13  ;;  %v1207_v17 = vpop.f32.mrf.mxu2  ;;  %v1450_v18 = vpop.f32.mrf.mxu3 }
 0x132   : > { %v1922_v19 = vpop.eup %1921  ;;  %v1208_v20 = vadd.f32 %v2516_v40, %v1207_v17  ;;  %v1451_v21 = vadd.f32 %v2516_v40, %v1450_v18 }
 0x133   : > { %v1924_v22 = vpop.eup %1923  ;;  %v1296_v23 = vadd.f32 %v1922_v19, %v1053_v16 }
 0x134   : > { %1929 = vtanh.f32 %v1208_v20 }
 0x135   : > { %v1539_v26 = vadd.f32 %v1924_v22, %v1296_v23  ;;  %1931 = vtanh.f32 %v1451_v21  ;;  %v749_v27 = vpop.f32.mrf.mxu0  ;;  %v967_v28 = vpop.f32.mrf.mxu1 }
 0x136   : > { %v1926_v31 = vpop.eup %1925  ;;  %1802 = vmatmul.msk.f32.gmra.mxu2 %vm638_vm0, %v1777_v24  ;;  %v750_v32 = vadd.f32 %v2516_v40, %v749_v27  ;;  %v968_v33 = vadd.f32 %v2516_v40, %v967_v28  ;;  %1852 = vmatmul.msk.f32.gmra.mxu3 %vm638_vm0, %v1827_v25 }
 0x137   : > { %v1928_v34 = vpop.eup %1927  ;;  %v1564_v35 = vmul.f32 0.25, %v1539_v26 }
 0x138   : > { %v1054_v36 = vadd.f32 %v1928_v34, %v1926_v31  ;;  %1933 = vtanh.f32 %v750_v32  ;;  %1702 = vmatmul.msk.f32.gmra.mxu0 %vm638_vm0, %v632_v29  ;;  %1752 = vmatmul.msk.f32.gmra.mxu1 %vm638_vm0, %v1727_v30 }
 0x139   : > { %1590 = vst.msk [vmem:[%s2552_s20 + $0x20] sm:$0xff] %vm1585_vm1, %v1564_v35  ;;  %1935 = vtanh.f32 %v968_v33  ;;  %v1210_v37 = vpop.f32.mrf.mxu2  ;;  %v1453_v38 = vpop.f32.mrf.mxu3 }
 0x13a   : > { %v1930_v39 = vpop.eup %1929  ;;  %v1211_v41 = vadd.f32 %v2516_v40, %v1210_v37  ;;  %v1454_v42 = vadd.f32 %v2516_v40, %v1453_v38 }
 0x13b   : > { %v1932_v43 = vpop.eup %1931  ;;  %v1297_v44 = vadd.f32 %v1930_v39, %v1054_v36 }
 0x13c   : > { %1937 = vtanh.f32 %v1211_v41 }
 0x13d   : > { %v1540_v47 = vadd.f32 %v1932_v43, %v1297_v44  ;;  %1939 = vtanh.f32 %v1454_v42  ;;  %v752_v48 = vpop.f32.mrf.mxu0  ;;  %v970_v49 = vpop.f32.mrf.mxu1 }
 0x13e   : > { %v1934_v52 = vpop.eup %1933  ;;  %1803 = vmatmul.msk.f32.gmra.mxu2 %vm638_vm0, %v1778_v45  ;;  %v753_v53 = vadd.f32 %v2516_v40, %v752_v48  ;;  %v971_v54 = vadd.f32 %v2516_v40, %v970_v49  ;;  %1853 = vmatmul.msk.f32.gmra.mxu3 %vm638_vm0, %v1828_v46 }
 0x13f   : > { %v1936_v55 = vpop.eup %1935  ;;  %v1565_v56 = vmul.f32 0.25, %v1540_v47 }
 0x140   : > { %v1055_v57 = vadd.f32 %v1936_v55, %v1934_v52  ;;  %1941 = vtanh.f32 %v753_v53  ;;  %1703 = vmatmul.msk.f32.gmra.mxu0 %vm638_vm0, %v633_v50  ;;  %1753 = vmatmul.msk.f32.gmra.mxu1 %vm638_vm0, %v1728_v51 }
 0x141   : > { %1591 = vst.msk [vmem:[%s2552_s20 + $0x28] sm:$0xff] %vm1585_vm1, %v1565_v56  ;;  %1943 = vtanh.f32 %v971_v54  ;;  %v1213_v58 = vpop.f32.mrf.mxu2  ;;  %v1456_v59 = vpop.f32.mrf.mxu3 }
 0x142   : > { %v1938_v60 = vpop.eup %1937  ;;  %v1214_v61 = vadd.f32 %v2516_v40, %v1213_v58  ;;  %v1457_v62 = vadd.f32 %v2516_v40, %v1456_v59 }
 0x143   : > { %v1940_v63 = vpop.eup %1939  ;;  %v1298_v0 = vadd.f32 %v1938_v60, %v1055_v57 }
 0x144   : > { %1945 = vtanh.f32 %v1214_v61 }
 0x145   : > { %v1541_v3 = vadd.f32 %v1940_v63, %v1298_v0  ;;  %1947 = vtanh.f32 %v1457_v62  ;;  %v755_v4 = vpop.f32.mrf.mxu0  ;;  %v973_v5 = vpop.f32.mrf.mxu1 }
 0x146   : > { %v1942_v8 = vpop.eup %1941  ;;  %1804 = vmatmul.msk.f32.gmra.mxu2 %vm638_vm0, %v1779_v1  ;;  %v756_v9 = vadd.f32 %v2516_v40, %v755_v4  ;;  %v974_v10 = vadd.f32 %v2516_v40, %v973_v5  ;;  %1854 = vmatmul.msk.f32.gmra.mxu3 %vm638_vm0, %v1829_v2 }
 0x147   : > { %v1944_v11 = vpop.eup %1943  ;;  %v1566_v12 = vmul.f32 0.25, %v1541_v3 }
 0x148   : > { %v1056_v13 = vadd.f32 %v1944_v11, %v1942_v8  ;;  %1949 = vtanh.f32 %v756_v9  ;;  %1704 = vmatmul.msk.f32.gmra.mxu0 %vm638_vm0, %v634_v6  ;;  %1754 = vmatmul.msk.f32.gmra.mxu1 %vm638_vm0, %v1729_v7 }
 0x149   : > { %1592 = vst.msk [vmem:[%s2552_s20 + $0x30] sm:$0xff] %vm1585_vm1, %v1566_v12  ;;  %1951 = vtanh.f32 %v974_v10  ;;  %v1216_v14 = vpop.f32.mrf.mxu2  ;;  %v1459_v15 = vpop.f32.mrf.mxu3 }
 0x14a   : > { %v1946_v16 = vpop.eup %1945  ;;  %v1217_v17 = vadd.f32 %v2516_v40, %v1216_v14  ;;  %v1460_v18 = vadd.f32 %v2516_v40, %v1459_v15 }
 0x14b   : > { %v1948_v19 = vpop.eup %1947  ;;  %v1299_v20 = vadd.f32 %v1946_v16, %v1056_v13 }
 0x14c   : > { %1953 = vtanh.f32 %v1217_v17 }
 0x14d   : > { %v1542_v21 = vadd.f32 %v1948_v19, %v1299_v20  ;;  %1955 = vtanh.f32 %v1460_v18  ;;  %v758_v22 = vpop.f32.mrf.mxu0  ;;  %v976_v23 = vpop.f32.mrf.mxu1 }
 0x14e   : > { %v1950_v24 = vpop.eup %1949  ;;  %v759_v25 = vadd.f32 %v2516_v40, %v758_v22  ;;  %v977_v26 = vadd.f32 %v2516_v40, %v976_v23 }
 0x14f   : > { %v1952_v27 = vpop.eup %1951  ;;  %v1567_v28 = vmul.f32 0.25, %v1542_v21 }
 0x150   : > { %v1057_v29 = vadd.f32 %v1952_v27, %v1950_v24  ;;  %1957 = vtanh.f32 %v759_v25 }
 0x151   : > { %1593 = vst.msk [vmem:[%s2552_s20 + $0x38] sm:$0xff] %vm1585_vm1, %v1567_v28  ;;  %1959 = vtanh.f32 %v977_v26  ;;  %v1219_v30 = vpop.f32.mrf.mxu2  ;;  %v1462_v31 = vpop.f32.mrf.mxu3 }
 0x152   : > { %v1954_v32 = vpop.eup %1953  ;;  %v1220_v33 = vadd.f32 %v2516_v40, %v1219_v30  ;;  %v1463_v34 = vadd.f32 %v2516_v40, %v1462_v31 }
 0x153   : > { %v1956_v35 = vpop.eup %1955  ;;  %v1300_v36 = vadd.f32 %v1954_v32, %v1057_v29 }
 0x154   : > { %1961 = vtanh.f32 %v1220_v33 }
 0x155   : > { %v1543_v37 = vadd.f32 %v1956_v35, %v1300_v36  ;;  %1963 = vtanh.f32 %v1463_v34  ;;  %v761_v38 = vpop.f32.mrf.mxu0  ;;  %v979_v39 = vpop.f32.mrf.mxu1 }
 0x156   : > { %v1958_v41 = vpop.eup %1957  ;;  %v762_v42 = vadd.f32 %v2516_v40, %v761_v38  ;;  %v980_v43 = vadd.f32 %v2516_v40, %v979_v39 }
 0x157   : > { %v1960_v44 = vpop.eup %1959  ;;  %v1568_v45 = vmul.f32 0.25, %v1543_v37 }
 0x158   : > { %v1058_v46 = vadd.f32 %v1960_v44, %v1958_v41  ;;  %1965 = vtanh.f32 %v762_v42 }
 0x159   : > { %1594 = vst.msk [vmem:[%s2552_s20 + $0x40] sm:$0xff] %vm1585_vm1, %v1568_v45  ;;  %1967 = vtanh.f32 %v980_v43  ;;  %v1222_v47 = vpop.f32.mrf.mxu2  ;;  %v1465_v48 = vpop.f32.mrf.mxu3 }
 0x15a   : > { %v1962_v49 = vpop.eup %1961  ;;  %v1223_v50 = vadd.f32 %v2516_v40, %v1222_v47  ;;  %v1466_v51 = vadd.f32 %v2516_v40, %v1465_v48 }
 0x15b   : > { %v1964_v52 = vpop.eup %1963  ;;  %v1301_v53 = vadd.f32 %v1962_v49, %v1058_v46 }
 0x15c   : > { %1969 = vtanh.f32 %v1223_v50 }
 0x15d   : > { %v1544_v54 = vadd.f32 %v1964_v52, %v1301_v53  ;;  %1971 = vtanh.f32 %v1466_v51  ;;  %v764_v55 = vpop.f32.mrf.mxu0  ;;  %v982_v56 = vpop.f32.mrf.mxu1 }
 0x15e   : > { %v1966_v57 = vpop.eup %1965  ;;  %v765_v58 = vadd.f32 %v2516_v40, %v764_v55  ;;  %v983_v59 = vadd.f32 %v2516_v40, %v982_v56 }
 0x15f   : > { %v1968_v60 = vpop.eup %1967  ;;  %v1569_v61 = vmul.f32 0.25, %v1544_v54 }
 0x160   : > { %v1059_v62 = vadd.f32 %v1968_v60, %v1966_v57  ;;  %1973 = vtanh.f32 %v765_v58 }
 0x161   : > { %1595 = vst.msk [vmem:[%s2552_s20 + $0x48] sm:$0xff] %vm1585_vm1, %v1569_v61  ;;  %1975 = vtanh.f32 %v983_v59  ;;  %v1225_v63 = vpop.f32.mrf.mxu2  ;;  %v1468_v0 = vpop.f32.mrf.mxu3 }
 0x162   : > { %v1970_v1 = vpop.eup %1969  ;;  %v1226_v2 = vadd.f32 %v2516_v40, %v1225_v63  ;;  %v1469_v3 = vadd.f32 %v2516_v40, %v1468_v0 }
 0x163   : > { %v1972_v4 = vpop.eup %1971  ;;  %v1302_v5 = vadd.f32 %v1970_v1, %v1059_v62 }
 0x164   : > { %1977 = vtanh.f32 %v1226_v2 }
 0x165   : > { %v1545_v6 = vadd.f32 %v1972_v4, %v1302_v5  ;;  %1979 = vtanh.f32 %v1469_v3  ;;  %v767_v7 = vpop.f32.mrf.mxu0  ;;  %v985_v8 = vpop.f32.mrf.mxu1 }
 0x166   : > { %v1974_v9 = vpop.eup %1973  ;;  %v768_v10 = vadd.f32 %v2516_v40, %v767_v7  ;;  %v986_v11 = vadd.f32 %v2516_v40, %v985_v8 }
 0x167   : > { %v1976_v12 = vpop.eup %1975  ;;  %v1570_v13 = vmul.f32 0.25, %v1545_v6 }
 0x168   : > { %v1060_v14 = vadd.f32 %v1976_v12, %v1974_v9  ;;  %1981 = vtanh.f32 %v768_v10 }
 0x169   : > { %1596 = vst.msk [vmem:[%s2552_s20 + $0x50] sm:$0xff] %vm1585_vm1, %v1570_v13  ;;  %1983 = vtanh.f32 %v986_v11  ;;  %v1228_v15 = vpop.f32.mrf.mxu2  ;;  %v1471_v16 = vpop.f32.mrf.mxu3 }
 0x16a   : > { %v1978_v17 = vpop.eup %1977  ;;  %v1229_v18 = vadd.f32 %v2516_v40, %v1228_v15  ;;  %v1472_v19 = vadd.f32 %v2516_v40, %v1471_v16 }
 0x16b   : > { %v1980_v20 = vpop.eup %1979  ;;  %v1303_v21 = vadd.f32 %v1978_v17, %v1060_v14 }
 0x16c   : > { %1985 = vtanh.f32 %v1229_v18 }
 0x16d   : > { %v1546_v22 = vadd.f32 %v1980_v20, %v1303_v21  ;;  %1987 = vtanh.f32 %v1472_v19  ;;  %v770_v23 = vpop.f32.mrf.mxu0  ;;  %v988_v24 = vpop.f32.mrf.mxu1 }
 0x16e   : > { %v1982_v25 = vpop.eup %1981  ;;  %v771_v26 = vadd.f32 %v2516_v40, %v770_v23  ;;  %v989_v27 = vadd.f32 %v2516_v40, %v988_v24 }
 0x16f   : > { %v1984_v28 = vpop.eup %1983  ;;  %v1571_v29 = vmul.f32 0.25, %v1546_v22 }
 0x170   : > { %v1061_v30 = vadd.f32 %v1984_v28, %v1982_v25  ;;  %1989 = vtanh.f32 %v771_v26 }
 0x171   : > { %1597 = vst.msk [vmem:[%s2552_s20 + $0x58] sm:$0xff] %vm1585_vm1, %v1571_v29  ;;  %1991 = vtanh.f32 %v989_v27  ;;  %v1231_v31 = vpop.f32.mrf.mxu2  ;;  %v1474_v32 = vpop.f32.mrf.mxu3 }
 0x172   : > { %v1986_v33 = vpop.eup %1985  ;;  %v1232_v34 = vadd.f32 %v2516_v40, %v1231_v31  ;;  %v1475_v35 = vadd.f32 %v2516_v40, %v1474_v32 }
 0x173   : > { %v1988_v36 = vpop.eup %1987  ;;  %v1304_v37 = vadd.f32 %v1986_v33, %v1061_v30 }
 0x174   : > { %1993 = vtanh.f32 %v1232_v34 }
 0x175   : > { %v1547_v38 = vadd.f32 %v1988_v36, %v1304_v37  ;;  %1995 = vtanh.f32 %v1475_v35  ;;  %v773_v39 = vpop.f32.mrf.mxu0  ;;  %v991_v41 = vpop.f32.mrf.mxu1 }
 0x176   : > { %v1990_v42 = vpop.eup %1989  ;;  %v774_v43 = vadd.f32 %v2516_v40, %v773_v39  ;;  %v992_v44 = vadd.f32 %v2516_v40, %v991_v41 }
 0x177   : > { %v1992_v45 = vpop.eup %1991  ;;  %v1572_v46 = vmul.f32 0.25, %v1547_v38 }
 0x178   : > { %v1062_v47 = vadd.f32 %v1992_v45, %v1990_v42  ;;  %1997 = vtanh.f32 %v774_v43 }
 0x179   : > { %1598 = vst.msk [vmem:[%s2552_s20 + $0x60] sm:$0xff] %vm1585_vm1, %v1572_v46  ;;  %1999 = vtanh.f32 %v992_v44  ;;  %v1234_v48 = vpop.f32.mrf.mxu2  ;;  %v1477_v49 = vpop.f32.mrf.mxu3 }
 0x17a   : > { %v1994_v50 = vpop.eup %1993  ;;  %v1235_v51 = vadd.f32 %v2516_v40, %v1234_v48  ;;  %v1478_v52 = vadd.f32 %v2516_v40, %v1477_v49 }
 0x17b   : > { %v1996_v53 = vpop.eup %1995  ;;  %v1305_v54 = vadd.f32 %v1994_v50, %v1062_v47 }
 0x17c   : > { %2001 = vtanh.f32 %v1235_v51 }
 0x17d   : > { %v1548_v55 = vadd.f32 %v1996_v53, %v1305_v54  ;;  %2003 = vtanh.f32 %v1478_v52  ;;  %v776_v56 = vpop.f32.mrf.mxu0  ;;  %v994_v57 = vpop.f32.mrf.mxu1 }
 0x17e   : > { %v1998_v58 = vpop.eup %1997  ;;  %v777_v59 = vadd.f32 %v2516_v40, %v776_v56  ;;  %v995_v60 = vadd.f32 %v2516_v40, %v994_v57 }
 0x17f   : > { %v2000_v61 = vpop.eup %1999  ;;  %v1573_v62 = vmul.f32 0.25, %v1548_v55 }
 0x180   : > { %v1063_v63 = vadd.f32 %v2000_v61, %v1998_v58  ;;  %2005 = vtanh.f32 %v777_v59 }
 0x181   : > { %1599 = vst.msk [vmem:[%s2552_s20 + $0x68] sm:$0xff] %vm1585_vm1, %v1573_v62  ;;  %2007 = vtanh.f32 %v995_v60  ;;  %v1237_v0 = vpop.f32.mrf.mxu2  ;;  %v1480_v1 = vpop.f32.mrf.mxu3 }
 0x182   : > { %v2002_v2 = vpop.eup %2001  ;;  %v1238_v3 = vadd.f32 %v2516_v40, %v1237_v0  ;;  %v1481_v4 = vadd.f32 %v2516_v40, %v1480_v1 }
 0x183   : > { %v2004_v5 = vpop.eup %2003  ;;  %v1306_v6 = vadd.f32 %v2002_v2, %v1063_v63 }
 0x184   : > { %2009 = vtanh.f32 %v1238_v3 }
 0x185   : > { %v1549_v7 = vadd.f32 %v2004_v5, %v1306_v6  ;;  %2011 = vtanh.f32 %v1481_v4  ;;  %v779_v8 = vpop.f32.mrf.mxu0  ;;  %v997_v9 = vpop.f32.mrf.mxu1 }
 0x186   : > { %v2006_v10 = vpop.eup %2005  ;;  %v780_v11 = vadd.f32 %v2516_v40, %v779_v8  ;;  %v998_v12 = vadd.f32 %v2516_v40, %v997_v9 }
 0x187   : > { %v2008_v13 = vpop.eup %2007  ;;  %v1574_v14 = vmul.f32 0.25, %v1549_v7 }
 0x188   : > { %v1064_v15 = vadd.f32 %v2008_v13, %v2006_v10  ;;  %2013 = vtanh.f32 %v780_v11 }
 0x189   : > { %1600 = vst.msk [vmem:[%s2552_s20 + $0x70] sm:$0xff] %vm1585_vm1, %v1574_v14  ;;  %2015 = vtanh.f32 %v998_v12  ;;  %v1240_v16 = vpop.f32.mrf.mxu2  ;;  %v1483_v17 = vpop.f32.mrf.mxu3 }
 0x18a   : > { %v2010_v18 = vpop.eup %2009  ;;  %v1241_v19 = vadd.f32 %v2516_v40, %v1240_v16  ;;  %v1484_v20 = vadd.f32 %v2516_v40, %v1483_v17 }
 0x18b   : > { %v2012_v21 = vpop.eup %2011  ;;  %v1307_v22 = vadd.f32 %v2010_v18, %v1064_v15 }
 0x18c   : > { %2017 = vtanh.f32 %v1241_v19 }
 0x18d   : > { %v1550_v23 = vadd.f32 %v2012_v21, %v1307_v22  ;;  %2019 = vtanh.f32 %v1484_v20  ;;  %v782_v24 = vpop.f32.mrf.mxu0  ;;  %v1000_v25 = vpop.f32.mrf.mxu1 }
 0x18e   : > { %v2014_v26 = vpop.eup %2013  ;;  %v783_v27 = vadd.f32 %v2516_v40, %v782_v24  ;;  %v1001_v28 = vadd.f32 %v2516_v40, %v1000_v25 }
 0x18f   : > { %v2016_v29 = vpop.eup %2015  ;;  %v1575_v30 = vmul.f32 0.25, %v1550_v23 }
 0x190   : > { %v1065_v31 = vadd.f32 %v2016_v29, %v2014_v26  ;;  %2021 = vtanh.f32 %v783_v27 }
 0x191   : > { %1601 = vst.msk [vmem:[%s2552_s20 + $0x78] sm:$0xff] %vm1585_vm1, %v1575_v30  ;;  %2023 = vtanh.f32 %v1001_v28  ;;  %v1243_v32 = vpop.f32.mrf.mxu2  ;;  %v1486_v33 = vpop.f32.mrf.mxu3  ;;  %v2723_v28 = vld [vmem:[%s2765_s2] ss:$0 sm:$0xff] }
 0x192   : > { %v2018_v34 = vpop.eup %2017  ;;  %v1244_v35 = vadd.f32 %v2516_v40, %v1243_v32  ;;  %v1487_v36 = vadd.f32 %v2516_v40, %v1486_v33 }
 0x193   : > { %v2020_v37 = vpop.eup %2019  ;;  %v1308_v38 = vadd.f32 %v2018_v34, %v1065_v31 }
 0x194   : > { %2025 = vtanh.f32 %v1244_v35 }
 0x195   : > { %v1551_v39 = vadd.f32 %v2020_v37, %v1308_v38  ;;  %2027 = vtanh.f32 %v1487_v36  ;;  %v785_v41 = vpop.f32.mrf.mxu0  ;;  %v1003_v42 = vpop.f32.mrf.mxu1 }
 0x196   : > { %v2022_v43 = vpop.eup %2021  ;;  %v786_v44 = vadd.f32 %v2516_v40, %v785_v41  ;;  %v1004_v45 = vadd.f32 %v2516_v40, %v1003_v42 }
 0x197   : > { %v2024_v46 = vpop.eup %2023  ;;  %v1576_v47 = vmul.f32 0.25, %v1551_v39 }
 0x198   : > { %v1066_v48 = vadd.f32 %v2024_v46, %v2022_v43  ;;  %2029 = vtanh.f32 %v786_v44 }
 0x199   : > { %1602 = vst.msk [vmem:[%s2552_s20 + $0x80] sm:$0xff] %vm1585_vm1, %v1576_v47  ;;  %2031 = vtanh.f32 %v1004_v45  ;;  %v1246_v49 = vpop.f32.mrf.mxu2  ;;  %v1489_v50 = vpop.f32.mrf.mxu3 }
 0x19a   : > { %v2026_v51 = vpop.eup %2025  ;;  %v1247_v52 = vadd.f32 %v2516_v40, %v1246_v49  ;;  %v1490_v53 = vadd.f32 %v2516_v40, %v1489_v50 }
 0x19b   : > { %v2028_v54 = vpop.eup %2027  ;;  %v1309_v55 = vadd.f32 %v2026_v51, %v1066_v48 }
 0x19c   : > { %2033 = vtanh.f32 %v1247_v52 }
 0x19d   : > { %v1552_v56 = vadd.f32 %v2028_v54, %v1309_v55  ;;  %2035 = vtanh.f32 %v1490_v53  ;;  %v788_v57 = vpop.f32.mrf.mxu0  ;;  %v1006_v58 = vpop.f32.mrf.mxu1 }
 0x19e   : > { %v2030_v59 = vpop.eup %2029  ;;  %v789_v60 = vadd.f32 %v2516_v40, %v788_v57  ;;  %v1007_v61 = vadd.f32 %v2516_v40, %v1006_v58 }
 0x19f   : > { %v2032_v62 = vpop.eup %2031  ;;  %v1577_v63 = vmul.f32 0.25, %v1552_v56 }
 0x1a0   : > { %v1067_v0 = vadd.f32 %v2032_v62, %v2030_v59  ;;  %2037 = vtanh.f32 %v789_v60 }
 0x1a1   : > { %1603 = vst.msk [vmem:[%s2552_s20 + $0x88] sm:$0xff] %vm1585_vm1, %v1577_v63  ;;  %2039 = vtanh.f32 %v1007_v61  ;;  %v1249_v1 = vpop.f32.mrf.mxu2  ;;  %v1492_v2 = vpop.f32.mrf.mxu3 }
 0x1a2   : > { %v2034_v3 = vpop.eup %2033  ;;  %v1250_v4 = vadd.f32 %v2516_v40, %v1249_v1  ;;  %v1493_v5 = vadd.f32 %v2516_v40, %v1492_v2 }
 0x1a3   : > { %v2036_v6 = vpop.eup %2035  ;;  %v1310_v7 = vadd.f32 %v2034_v3, %v1067_v0 }
 0x1a4   : > { %2041 = vtanh.f32 %v1250_v4 }
 0x1a5   : > { %v1553_v8 = vadd.f32 %v2036_v6, %v1310_v7  ;;  %2043 = vtanh.f32 %v1493_v5  ;;  %v791_v9 = vpop.f32.mrf.mxu0  ;;  %v1009_v10 = vpop.f32.mrf.mxu1 }
 0x1a6   : > { %v2038_v11 = vpop.eup %2037  ;;  %v792_v12 = vadd.f32 %v2516_v40, %v791_v9  ;;  %v1010_v13 = vadd.f32 %v2516_v40, %v1009_v10 }
 0x1a7   : > { %v2040_v14 = vpop.eup %2039  ;;  %v1578_v15 = vmul.f32 0.25, %v1553_v8 }
 0x1a8   : > { %v1068_v16 = vadd.f32 %v2040_v14, %v2038_v11  ;;  %2045 = vtanh.f32 %v792_v12 }
 0x1a9   : > { %1604 = vst.msk [vmem:[%s2552_s20 + $0x90] sm:$0xff] %vm1585_vm1, %v1578_v15  ;;  %2047 = vtanh.f32 %v1010_v13  ;;  %v1252_v17 = vpop.f32.mrf.mxu2  ;;  %v1495_v18 = vpop.f32.mrf.mxu3 }
 0x1aa   : > { %v2042_v19 = vpop.eup %2041  ;;  %v1253_v20 = vadd.f32 %v2516_v40, %v1252_v17  ;;  %v1496_v21 = vadd.f32 %v2516_v40, %v1495_v18 }
 0x1ab   : > { %v2044_v22 = vpop.eup %2043  ;;  %v1311_v23 = vadd.f32 %v2042_v19, %v1068_v16 }
 0x1ac   : > { %2049 = vtanh.f32 %v1253_v20 }
 0x1ad   : > { %v1554_v24 = vadd.f32 %v2044_v22, %v1311_v23  ;;  %2051 = vtanh.f32 %v1496_v21  ;;  %v794_v25 = vpop.f32.mrf.mxu0  ;;  %v1012_v26 = vpop.f32.mrf.mxu1 }
 0x1ae   : > { %v2046_v27 = vpop.eup %2045  ;;  %v795_v29 = vadd.f32 %v2723_v28, %v794_v25  ;;  %v1013_v30 = vadd.f32 %v2723_v28, %v1012_v26 }
 0x1af   : > { %v2048_v31 = vpop.eup %2047  ;;  %v1579_v40 = vmul.f32 0.25, %v1554_v24 }
 0x1b0   : > { %v1069_v32 = vadd.f32 %v2048_v31, %v2046_v27  ;;  %2053 = vtanh.f32 %v795_v29 }
 0x1b1   : > { %1605 = vst.msk [vmem:[%s2552_s20 + $0x98] sm:$0xff] %vm1585_vm1, %v1579_v40  ;;  %2055 = vtanh.f32 %v1013_v30  ;;  %v1255_v33 = vpop.f32.mrf.mxu2  ;;  %v1498_v34 = vpop.f32.mrf.mxu3 }
 0x1b2   : > { %v2050_v35 = vpop.eup %2049  ;;  %v1256_v36 = vadd.f32 %v2723_v28, %v1255_v33  ;;  %v1499_v37 = vadd.f32 %v2723_v28, %v1498_v34 }
 0x1b3   : > { %v2052_v38 = vpop.eup %2051  ;;  %v1312_v39 = vadd.f32 %v2050_v35, %v1069_v32 }
 0x1b4   : > { %2057 = vtanh.f32 %v1256_v36 }
 0x1b5   : > { %v1555_v41 = vadd.f32 %v2052_v38, %v1312_v39  ;;  %2059 = vtanh.f32 %v1499_v37  ;;  %v797_v42 = vpop.f32.mrf.mxu0  ;;  %v1015_v43 = vpop.f32.mrf.mxu1 }
 0x1b6   : > { %v2054_v44 = vpop.eup %2053  ;;  %v798_v45 = vadd.f32 %v2723_v28, %v797_v42  ;;  %v1016_v46 = vadd.f32 %v2723_v28, %v1015_v43 }
 0x1b7   : > { %v2056_v47 = vpop.eup %2055  ;;  %v1580_v48 = vmul.f32 0.25, %v1555_v41 }
 0x1b8   : > { %v1070_v49 = vadd.f32 %v2056_v47, %v2054_v44  ;;  %2061 = vtanh.f32 %v798_v45 }
 0x1b9   : > { %1606 = vst.msk [vmem:[%s2552_s20 + $0xa0] sm:$0xff] %vm1585_vm1, %v1580_v48  ;;  %2063 = vtanh.f32 %v1016_v46  ;;  %v1258_v50 = vpop.f32.mrf.mxu2  ;;  %v1501_v51 = vpop.f32.mrf.mxu3 }
 0x1ba   : > { %v2058_v52 = vpop.eup %2057  ;;  %v1259_v53 = vadd.f32 %v2723_v28, %v1258_v50  ;;  %v1502_v54 = vadd.f32 %v2723_v28, %v1501_v51 }
 0x1bb   : > { %v2060_v55 = vpop.eup %2059  ;;  %v1313_v56 = vadd.f32 %v2058_v52, %v1070_v49 }
 0x1bc   : > { %2065 = vtanh.f32 %v1259_v53 }
 0x1bd   : > { %v1556_v57 = vadd.f32 %v2060_v55, %v1313_v56  ;;  %2067 = vtanh.f32 %v1502_v54  ;;  %v800_v58 = vpop.f32.mrf.mxu0  ;;  %v1018_v59 = vpop.f32.mrf.mxu1 }
 0x1be   : > { %v2062_v60 = vpop.eup %2061  ;;  %v801_v61 = vadd.f32 %v2723_v28, %v800_v58  ;;  %v1019_v62 = vadd.f32 %v2723_v28, %v1018_v59 }
 0x1bf   : > { %v2064_v63 = vpop.eup %2063  ;;  %v1581_v0 = vmul.f32 0.25, %v1556_v57 }
 0x1c0   : > { %v1071_v1 = vadd.f32 %v2064_v63, %v2062_v60  ;;  %2069 = vtanh.f32 %v801_v61 }
 0x1c1   : > { %1607 = vst.msk [vmem:[%s2552_s20 + $0xa8] sm:$0xff] %vm1585_vm1, %v1581_v0  ;;  %2071 = vtanh.f32 %v1019_v62  ;;  %v1261_v2 = vpop.f32.mrf.mxu2  ;;  %v1504_v3 = vpop.f32.mrf.mxu3 }
 0x1c2   : > { %v2066_v4 = vpop.eup %2065  ;;  %v1262_v5 = vadd.f32 %v2723_v28, %v1261_v2  ;;  %v1505_v6 = vadd.f32 %v2723_v28, %v1504_v3 }
 0x1c3   : > { %v2068_v7 = vpop.eup %2067  ;;  %v1314_v8 = vadd.f32 %v2066_v4, %v1071_v1 }
 0x1c4   : > { %2073 = vtanh.f32 %v1262_v5 }
 0x1c5   : > { %v1557_v9 = vadd.f32 %v2068_v7, %v1314_v8  ;;  %2075 = vtanh.f32 %v1505_v6  ;;  %v803_v10 = vpop.f32.mrf.mxu0  ;;  %v1021_v11 = vpop.f32.mrf.mxu1 }
 0x1c6   : > { %v2070_v12 = vpop.eup %2069  ;;  %v804_v13 = vadd.f32 %v2723_v28, %v803_v10  ;;  %v1022_v14 = vadd.f32 %v2723_v28, %v1021_v11 }
 0x1c7   : > { %v2072_v15 = vpop.eup %2071  ;;  %v1582_v16 = vmul.f32 0.25, %v1557_v9 }
 0x1c8   : > { %v1072_v17 = vadd.f32 %v2072_v15, %v2070_v12  ;;  %2077 = vtanh.f32 %v804_v13 }
 0x1c9   : > { %1608 = vst.msk [vmem:[%s2552_s20 + $0xb0] sm:$0xff] %vm1585_vm1, %v1582_v16  ;;  %2079 = vtanh.f32 %v1022_v14  ;;  %v1264_v18 = vpop.f32.mrf.mxu2  ;;  %v1507_v19 = vpop.f32.mrf.mxu3 }
 0x1ca   : > { %v2074_v20 = vpop.eup %2073  ;;  %v1265_v21 = vadd.f32 %v2723_v28, %v1264_v18  ;;  %v1508_v22 = vadd.f32 %v2723_v28, %v1507_v19 }
 0x1cb   : > { %v2076_v23 = vpop.eup %2075  ;;  %v1315_v24 = vadd.f32 %v2074_v20, %v1072_v17 }
 0x1cc   : > { %2081 = vtanh.f32 %v1265_v21 }
 0x1cd   : > { %v1558_v25 = vadd.f32 %v2076_v23, %v1315_v24  ;;  %2083 = vtanh.f32 %v1508_v22 }
 0x1ce   : > { %v2078_v26 = vpop.eup %2077 }
 0x1cf   : > { %v2080_v27 = vpop.eup %2079  ;;  %v1583_v29 = vmul.f32 0.25, %v1558_v25 }
 0x1d0   : > { %v1073_v30 = vadd.f32 %v2080_v27, %v2078_v26 }
 0x1d1   : > { %1609 = vst.msk [vmem:[%s2552_s20 + $0xb8] sm:$0xff] %vm1585_vm1, %v1583_v29 }
 0x1d2   : > { %v2082_v31 = vpop.eup %2081 }
 0x1d3   : > { %v2084_v40 = vpop.eup %2083  ;;  %v1316_v32 = vadd.f32 %v2082_v31, %v1073_v30 }
 0x1d5   : > { %v1559_v33 = vadd.f32 %v2084_v40, %v1316_v32 }
 0x1d7   : > { %v1584_v34 = vmul.f32 0.25, %v1559_v33 }
 0x1d9   : > { %1610 = vst.msk [vmem:[%s2552_s20 + $0xc0] sm:$0xff] %vm1585_vm1, %v1584_v34 }
 0x1da PF: > { %p10_p9 = scmp.ge.s32.totalorder %s2147_s16, 4   ;;  %s2767_s12 = smov %s2104_s13 }
 0x1db   : > { %s2768_s13 = smov %s2156_s19  ;;  %s2769_s14 = smov %s2147_s16 }
 0x1dc   :  { %12 = sbr.rel (!%p10_p9) target bundleno = 2 (0x2), region = 108 }

// kernel: lenet5_forward.4
= control target key start
LH: loop header
LB: loop body
LE: loop exit
PB: predicated region body
PF: predicated region fallthrough
CT: control target
= control target key end

     0   :  { %s870_s12 = smov 0   ;;  %s872_s13 = smov 0   ;;  %s1267_s0 = inlined_call_operand.vmem [shape: f32[4,64,152], index: 0, kind: input, shape index: {}]   ;;  %s1268_s1 = inlined_call_operand.vmem [shape: f32[152,16], index: 1, kind: input, shape index: {}]   ;;  %s1269_s2 = inlined_call_operand.vmem [shape: f32[1,16], index: 2, kind: input, shape index: {}]   ;;  %s1270_s3 = inlined_call_operand.vmem [shape: f32[64,16], index: 3, kind: output, shape index: {}]  }
   0x1   :  { %s874_s14 = smov 0  }
   0x2 LB: > { %s694_s15 = sadd.s32 4294967295, %s848_s14   ;;  %s887_s16 = sadd.s32 1, %s848_s14   ;;  %s848_s14 = sphi %s874_s14, %s1273_s14   ;;  %s844_s13 = sphi %s872_s13, %s1272_s13   ;;  %s840_s12 = sphi %s870_s12, %s1271_s12  }
   0x3   : > { %s17_s17 = ssub.s32 %s848_s14, %s887_s16  ;;  %s20_s18 = sadd.s32 1, %s844_s13 }
   0x4   : > { %p18_p0 = scmp.eq.s32.totalorder %s17_s17, 0  ;;  %p27_p1 = scmp.ne.s32.totalorder %s844_s13, %s840_s12 }
   0x5   : > { %p28_p2 = scmp.eq.s32.totalorder %s848_s14, 0  ;;  %p697_p4 = scmp.ge.s32.totalorder %s848_s14, 2 }
   0x6   : > { %s896_s19 = scalar_select %p18_p0, %s844_s13, %s20_s18  }
   0x7   : > { %p29_p3 = por %p28_p2, %p27_p1  ;;  %127 = sbr.rel (%p697_p4) target bundleno = 48 (0x30), region = 24 }
   0xc   : > { %130 = sbr.rel (!%p29_p3) target bundleno = 48 (0x30), region = 28  ;;  %s132_s20 = sand.u32 (%p29_p3), 1, %s844_s13  }
   0xd   : > { %s749_s21 = sshll.u32 (%p29_p3), %s848_s14, 6  ;;  %s698_s22 = sshll.u32 (%p29_p3), %s132_s20, 8 }
   0xe   : > { %s904_s25 = scalar_lea.vmem (%p29_p3), %s1267_s0, %s749_s21  ;;  %s909_s26 = scalar_lea.vmem (%p29_p3), [#allocation2], %s698_s22 }
   0xf   : > { %v151_v0 = vld [vmem:[%s904_s25] sm:$0xff] (%p29_p3)  ;;  %v153_v1 = vld [vmem:[%s904_s25 + $0x8] sm:$0xff] (%p29_p3)  ;;  %v155_v2 = vld [vmem:[%s904_s25 + $0x10] sm:$0xff] (%p29_p3) }
  0x10   : > { %152 = vst [vmem:[%s909_s26] sm:$0xff] (%p29_p3), %v151_v0  ;;  %v157_v3 = vld [vmem:[%s904_s25 + $0x18] sm:$0xff] (%p29_p3)  ;;  %v159_v4 = vld [vmem:[%s904_s25 + $0x20] sm:$0xff] (%p29_p3)  ;;  %v161_v5 = vld [vmem:[%s904_s25 + $0x28] sm:$0xff] (%p29_p3) }
  0x11   : > { %154 = vst [vmem:[%s909_s26 + $0x8] sm:$0xff] %v153_v1  ;;  %v163_v6 = vld [vmem:[%s904_s25 + $0x30] sm:$0xff]  ;;  %v165_v7 = vld [vmem:[%s904_s25 + $0x38] sm:$0xff]  ;;  %v167_v8 = vld [vmem:[%s904_s25 + $0x80] sm:$0xff] }
  0x12   : > { %156 = vst [vmem:[%s909_s26 + $0x10] sm:$0xff] %v155_v2  ;;  %v169_v9 = vld [vmem:[%s904_s25 + $0x88] sm:$0xff]  ;;  %v171_v10 = vld [vmem:[%s904_s25 + $0x90] sm:$0xff]  ;;  %v173_v11 = vld [vmem:[%s904_s25 + $0x98] sm:$0xff] }
  0x13   : > { %158 = vst [vmem:[%s909_s26 + $0x18] sm:$0xff] %v157_v3  ;;  %v175_v12 = vld [vmem:[%s904_s25 + $0xa0] sm:$0xff]  ;;  %v177_v13 = vld [vmem:[%s904_s25 + $0xa8] sm:$0xff]  ;;  %v179_v14 = vld [vmem:[%s904_s25 + $0xb0] sm:$0xff] }
  0x14   : > { %160 = vst [vmem:[%s909_s26 + $0x20] sm:$0xff] %v159_v4  ;;  %v181_v15 = vld [vmem:[%s904_s25 + $0xb8] sm:$0xff]  ;;  %v183_v16 = vld [vmem:[%s904_s25 + $0x100] sm:$0xff]  ;;  %v185_v17 = vld [vmem:[%s904_s25 + $0x108] sm:$0xff] }
  0x15   : > { %162 = vst [vmem:[%s909_s26 + $0x28] sm:$0xff] %v161_v5  ;;  %v187_v18 = vld [vmem:[%s904_s25 + $0x110] sm:$0xff]  ;;  %v189_v19 = vld [vmem:[%s904_s25 + $0x118] sm:$0xff]  ;;  %v191_v20 = vld [vmem:[%s904_s25 + $0x120] sm:$0xff] }
  0x16   : > { %164 = vst [vmem:[%s909_s26 + $0x30] sm:$0xff] %v163_v6  ;;  %v193_v21 = vld [vmem:[%s904_s25 + $0x128] sm:$0xff]  ;;  %v195_v22 = vld [vmem:[%s904_s25 + $0x130] sm:$0xff]  ;;  %v197_v23 = vld [vmem:[%s904_s25 + $0x138] sm:$0xff] }
  0x17   : > { %166 = vst [vmem:[%s909_s26 + $0x38] sm:$0xff] %v165_v7  ;;  %v199_v24 = vld [vmem:[%s904_s25 + $0x180] sm:$0xff]  ;;  %v201_v25 = vld [vmem:[%s904_s25 + $0x188] sm:$0xff]  ;;  %v203_v26 = vld [vmem:[%s904_s25 + $0x190] sm:$0xff] }
  0x18   : > { %168 = vst [vmem:[%s909_s26 + $0x40] sm:$0xff] %v167_v8  ;;  %v205_v27 = vld [vmem:[%s904_s25 + $0x198] sm:$0xff]  ;;  %v207_v28 = vld [vmem:[%s904_s25 + $0x1a0] sm:$0xff]  ;;  %v209_v29 = vld [vmem:[%s904_s25 + $0x1a8] sm:$0xff] }
  0x19   : > { %170 = vst [vmem:[%s909_s26 + $0x48] sm:$0xff] %v169_v9  ;;  %v211_v30 = vld [vmem:[%s904_s25 + $0x1b0] sm:$0xff]  ;;  %v213_v31 = vld [vmem:[%s904_s25 + $0x1b8] sm:$0xff] }
  0x1a   : > { %172 = vst [vmem:[%s909_s26 + $0x50] sm:$0xff] %v171_v10 }
  0x1b   : > { %174 = vst [vmem:[%s909_s26 + $0x58] sm:$0xff] %v173_v11 }
  0x1c   : > { %176 = vst [vmem:[%s909_s26 + $0x60] sm:$0xff] %v175_v12 }
  0x1d   : > { %178 = vst [vmem:[%s909_s26 + $0x68] sm:$0xff] %v177_v13 }
  0x1e   : > { %180 = vst [vmem:[%s909_s26 + $0x70] sm:$0xff] %v179_v14 }
  0x1f   : > { %182 = vst [vmem:[%s909_s26 + $0x78] sm:$0xff] %v181_v15 }
  0x20   : > { %184 = vst [vmem:[%s909_s26 + $0x80] sm:$0xff] %v183_v16 }
  0x21   : > { %186 = vst [vmem:[%s909_s26 + $0x88] sm:$0xff] %v185_v17 }
  0x22   : > { %188 = vst [vmem:[%s909_s26 + $0x90] sm:$0xff] %v187_v18 }
  0x23   : > { %190 = vst [vmem:[%s909_s26 + $0x98] sm:$0xff] %v189_v19 }
  0x24   : > { %192 = vst [vmem:[%s909_s26 + $0xa0] sm:$0xff] %v191_v20 }
  0x25   : > { %194 = vst [vmem:[%s909_s26 + $0xa8] sm:$0xff] %v193_v21 }
  0x26   : > { %196 = vst [vmem:[%s909_s26 + $0xb0] sm:$0xff] %v195_v22 }
  0x27   : > { %198 = vst [vmem:[%s909_s26 + $0xb8] sm:$0xff] %v197_v23 }
  0x28   : > { %200 = vst [vmem:[%s909_s26 + $0xc0] sm:$0xff] %v199_v24 }
  0x29   : > { %202 = vst [vmem:[%s909_s26 + $0xc8] sm:$0xff] %v201_v25 }
  0x2a   : > { %204 = vst [vmem:[%s909_s26 + $0xd0] sm:$0xff] %v203_v26 }
  0x2b   : > { %206 = vst [vmem:[%s909_s26 + $0xd8] sm:$0xff] %v205_v27 }
  0x2c   : > { %208 = vst [vmem:[%s909_s26 + $0xe0] sm:$0xff] %v207_v28 }
  0x2d   : > { %210 = vst [vmem:[%s909_s26 + $0xe8] sm:$0xff] %v209_v29 }
  0x2e   : > { %212 = vst [vmem:[%s909_s26 + $0xf0] sm:$0xff] %v211_v30 }
  0x2f   : > { %214 = vst [vmem:[%s909_s26 + $0xf8] sm:$0xff] %v213_v31 }
  0x30 PF: > { %p702_p5 = scmp.ge.s32.totalorder %s848_s14, 1  ;;  %p219_p6 = scmp.lt.s32.totalorder %s848_s14, 3 }
  0x32   : > { %p220_p7 = pnand %p702_p5, %p219_p6 }
  0x33   : > { %s226_s6 = sand.u32 (!%p220_p7), 1, %s840_s12   ;;  %s704_s26 = sshll.u32 (!%p220_p7), %s694_s15, 2 }
  0x34   : > { %223 = sbr.rel (%p220_p7) target bundleno = 284 (0x11c), region = 51  ;;  %s703_s9 = sshll.u32 (!%p220_p7), %s226_s6, 8 }
  0x35   : > { %s1012_s18 = scalar_lea.vmem (!%p220_p7), [#allocation2], %s703_s9  ;;  %p251_p8 = scmp.lt.s32.totalorder (!%p220_p7), %s704_s26, 7 }
  0x39   : > { %v977_v32 = vld [vmem:[%s1268_s1 + $0x78] sm:$0xff]  ;;  %v982_v33 = vld [vmem:[%s1268_s1 + $0x90] sm:$0xff]  ;;  %v995_v35 = vld [vmem:[%s1268_s1 + $0x88] sm:$0xff]  ;;  %vm287_vm0 = vcmask 195584   ;;  %s1275_s26 = smov (!%p251_p8, %s704_s26), 7  ;;  %vm627_vm1 = vcmask 130048  }
  0x3a   : > { %v987_v34 = vld [vmem:[%s1268_s1 + $0x70] sm:$0xff]  ;;  %300 = vmatpush.msra.mxu0 %v977_v32  ;;  %383 = vmatpush.msra.mxu2 %v977_v32  ;;  %v1001_v36 = vld [vmem:[%s1268_s1 + $0x68] sm:$0xff]  ;;  %v1009_v37 = vld [vmem:[%s1268_s1 + $0x80] sm:$0xff]  ;;  %s705_s14 = sshll.u32 %s1275_s26, 3 }
  0x3b   : > { %425 = vmatpush.msra.mxu3 %v982_v33  ;;  %342 = vmatpush.msra.mxu1 %v982_v33  ;;  %v711_v38 = vld [vmem:[%s1012_s18 + $0x48] sm:$0xff]  ;;  %v1018_v39 = vld [vmem:[%s1268_s1 + $0x60] sm:$0xff]  ;;  %v1028_v41 = vld [vmem:[%s1268_s1 + $0x58] sm:$0xff]  ;;  %s1246_s28 = scalar_lea.vmem %s1270_s3, %s705_s14 }
  0x3c   : > { %301 = vmatpush.msra.mxu0 %v987_v34  ;;  %384 = vmatpush.msra.mxu2 %v987_v34  ;;  %v277_v40 = vld [vmem:[%s1012_s18 + $0x8] sm:$0xff]  ;;  %v1038_v42 = vld [vmem:[%s1268_s1 + $0x50] sm:$0xff]  ;;  %v713_v44 = vld [vmem:[%s1012_s18 + $0x58] sm:$0xff] }
  0x3d   : > { %426 = vmatpush.msra.mxu3 %v995_v35  ;;  %343 = vmatpush.msra.mxu1 %v995_v35  ;;  %v1046_v43 = vld [vmem:[%s1268_s1 + $0x48] sm:$0xff]  ;;  %v1056_v45 = vld [vmem:[%s1268_s1 + $0x40] sm:$0xff]  ;;  %v1065_v46 = vld [vmem:[%s1268_s1 + $0x38] sm:$0xff] }
  0x3e   : > { %302 = vmatpush.msra.mxu0 %v1001_v36  ;;  %385 = vmatpush.msra.mxu2 %v1001_v36  ;;  %v279_v47 = vld [vmem:[%s1012_s18 + $0x18] sm:$0xff]  ;;  %v1076_v48 = vld [vmem:[%s1268_s1 + $0x30] sm:$0xff]  ;;  %v1085_v49 = vld [vmem:[%s1268_s1 + $0x28] sm:$0xff] }
  0x3f   : > { %427 = vmatpush.msra.mxu3 %v1009_v37  ;;  %344 = vmatpush.msra.mxu1 %v1009_v37  ;;  %v715_v50 = vld [vmem:[%s1012_s18 + $0x68] sm:$0xff]  ;;  %v1095_v51 = vld [vmem:[%s1268_s1 + $0x20] sm:$0xff]  ;;  %v1104_v52 = vld [vmem:[%s1268_s1 + $0x18] sm:$0xff] }
  0x40   : > { %718 = vmatmul.msk.f32.vlgmr.msra.gmra.mxu3 %vm287_vm0, %v711_v38  ;;  %303 = vmatpush.msra.mxu0 %v1018_v39  ;;  %v281_v53 = vld [vmem:[%s1012_s18 + $0x28] sm:$0xff]  ;;  %v1114_v54 = vld [vmem:[%s1268_s1 + $0x10] sm:$0xff]  ;;  %v717_v56 = vld [vmem:[%s1012_s18 + $0x78] sm:$0xff] }
  0x41   : > { %386 = vmatpush.msra.mxu2 %v1018_v39  ;;  %706 = vmatmul.msk.f32.vlgmr.msra.gmra.mxu1 %vm287_vm0, %v277_v40  ;;  %v1123_v55 = vld [vmem:[%s1268_s1 + $0x8] sm:$0xff]  ;;  %v1133_v57 = vld [vmem:[%s1268_s1] sm:$0xff]  ;;  %v283_v60 = vld [vmem:[%s1012_s18 + $0x38] sm:$0xff] }
  0x42   : > { %304 = vmatpush.msra.mxu0 %v1028_v41  ;;  %470 = vmatpush.msrb.mxu1 %v977_v32  ;;  %v276_v58 = vld [vmem:[%s1012_s18] sm:$0xff]  ;;  %v723_v61 = vld [vmem:[%s1012_s18 + $0x88] sm:$0xff]  ;;  %v278_v62 = vld [vmem:[%s1012_s18 + $0x10] sm:$0xff] }
  0x43   : > { %387 = vmatpush.msra.mxu2 %v1028_v41  ;;  %512 = vmatpush.msrb.mxu3 %v982_v33  ;;  %v710_v59 = vld [vmem:[%s1012_s18 + $0x40] sm:$0xff]  ;;  %v712_v63 = vld [vmem:[%s1012_s18 + $0x50] sm:$0xff]  ;;  %v725_v1 = vld [vmem:[%s1012_s18 + $0x98] sm:$0xff] }
  0x44   : > { %305 = vmatpush.msra.mxu0 %v1038_v42  ;;  %471 = vmatpush.msrb.mxu1 %v987_v34  ;;  %v722_v0 = vld [vmem:[%s1012_s18 + $0x80] sm:$0xff]  ;;  %v724_v4 = vld [vmem:[%s1012_s18 + $0x90] sm:$0xff]  ;;  %v727_v5 = vld [vmem:[%s1012_s18 + $0xa8] sm:$0xff] }
  0x45   : > { %388 = vmatpush.msra.mxu2 %v1038_v42  ;;  %513 = vmatpush.msrb.mxu3 %v995_v35  ;;  %v280_v2 = vld [vmem:[%s1012_s18 + $0x20] sm:$0xff]  ;;  %v282_v6 = vld [vmem:[%s1012_s18 + $0x30] sm:$0xff]  ;;  %v729_v9 = vld [vmem:[%s1012_s18 + $0xb8] sm:$0xff] }
  0x46   : > { %306 = vmatpush.msra.mxu0 %v1046_v43  ;;  %472 = vmatpush.msrb.mxu1 %v1001_v36  ;;  %v714_v3 = vld [vmem:[%s1012_s18 + $0x60] sm:$0xff]  ;;  %v716_v7 = vld [vmem:[%s1012_s18 + $0x70] sm:$0xff]  ;;  %v735_v10 = vld [vmem:[%s1012_s18 + $0xc8] sm:$0xff] }
  0x47   : > { %389 = vmatpush.msra.mxu2 %v1046_v43  ;;  %514 = vmatpush.msrb.mxu3 %v1009_v37  ;;  %v726_v8 = vld [vmem:[%s1012_s18 + $0xa0] sm:$0xff]  ;;  %v728_v11 = vld [vmem:[%s1012_s18 + $0xb0] sm:$0xff]  ;;  %v741_v13 = vld [vmem:[%s1012_s18 + $0xf8] sm:$0xff] }
  0x48   : > { %719 = vmatmul.msk.f32.gmra.mxu3 %vm287_vm0, %v713_v44  ;;  %307 = vmatpush.msra.mxu0 %v1056_v45  ;;  %v734_v12 = vld [vmem:[%s1012_s18 + $0xc0] sm:$0xff]  ;;  %v737_v14 = vld [vmem:[%s1012_s18 + $0xd8] sm:$0xff]  ;;  %v740_v15 = vld [vmem:[%s1012_s18 + $0xf0] sm:$0xff] }
  0x49   : > { %390 = vmatpush.msra.mxu2 %v1056_v45  ;;  %473 = vmatpush.msrb.mxu1 %v1018_v39  ;;  %v736_v16 = vld [vmem:[%s1012_s18 + $0xd0] sm:$0xff]  ;;  %v739_v17 = vld [vmem:[%s1012_s18 + $0xe8] sm:$0xff]  ;;  %v738_v18 = vld [vmem:[%s1012_s18 + $0xe0] sm:$0xff] }
  0x4a   : > { %308 = vmatpush.msra.mxu0 %v1065_v46  ;;  %707 = vmatmul.msk.f32.gmra.mxu1 %vm287_vm0, %v279_v47 }
  0x4b   : > { %391 = vmatpush.msra.mxu2 %v1065_v46  ;;  %474 = vmatpush.msrb.mxu1 %v1028_v41 }
  0x4c   : > { %309 = vmatpush.msra.mxu0 %v1076_v48  ;;  %766 = vmatpush.msra.mxu3 %v982_v33 }
  0x4d   : > { %392 = vmatpush.msra.mxu2 %v1076_v48  ;;  %475 = vmatpush.msrb.mxu1 %v1038_v42 }
  0x4e   : > { %310 = vmatpush.msra.mxu0 %v1085_v49  ;;  %767 = vmatpush.msra.mxu3 %v995_v35 }
  0x4f   : > { %393 = vmatpush.msra.mxu2 %v1085_v49  ;;  %476 = vmatpush.msrb.mxu1 %v1046_v43 }
  0x50   : > { %720 = vmatmul.msk.f32.gmra.mxu3 %vm287_vm0, %v715_v50  ;;  %311 = vmatpush.msra.mxu0 %v1095_v51 }
  0x51   : > { %394 = vmatpush.msra.mxu2 %v1095_v51  ;;  %477 = vmatpush.msrb.mxu1 %v1056_v45 }
  0x52   : > { %312 = vmatpush.msra.mxu0 %v1104_v52  ;;  %708 = vmatmul.msk.f32.gmra.mxu1 %vm287_vm0, %v281_v53 }
  0x53   : > { %395 = vmatpush.msra.mxu2 %v1104_v52  ;;  %478 = vmatpush.msrb.mxu1 %v1065_v46 }
  0x54   : > { %313 = vmatpush.msra.mxu0 %v1114_v54  ;;  %768 = vmatpush.msra.mxu3 %v1009_v37 }
  0x55   : > { %396 = vmatpush.msra.mxu2 %v1114_v54  ;;  %479 = vmatpush.msrb.mxu1 %v1076_v48 }
  0x56   : > { %314 = vmatpush.msra.mxu0 %v1123_v55 }
  0x57   : > { %397 = vmatpush.msra.mxu2 %v1123_v55  ;;  %480 = vmatpush.msrb.mxu1 %v1085_v49 }
  0x58   : > { %721 = vmatmul.msk.f32.gmra.mxu3 %vm287_vm0, %v717_v56  ;;  %315 = vmatpush.msra.mxu0 %v1133_v57 }
  0x59   : > { %398 = vmatpush.msra.mxu2 %v1133_v57  ;;  %316 = vmatmul.f32.vlgmr.msra.gmra.mxu0 %v276_v58 }
  0x5a   : > { %399 = vmatmul.f32.vlgmr.msra.gmra.mxu2 %v710_v59  ;;  %481 = vmatpush.msrb.mxu1 %v1095_v51 }
  0x5b   : > { %599 = vmatpush.msrb.mxu2 %v982_v33  ;;  %709 = vmatmul.msk.f32.gmra.mxu1 %vm287_vm0, %v283_v60 }
  0x5c   : > { %482 = vmatpush.msrb.mxu1 %v1104_v52  ;;  %557 = vmatpush.msrb.mxu0 %v977_v32 }
  0x5d   : > { %600 = vmatpush.msrb.mxu2 %v995_v35 }
  0x5e   : > { %483 = vmatpush.msrb.mxu1 %v1114_v54  ;;  %558 = vmatpush.msrb.mxu0 %v987_v34 }
  0x5f   : > { %601 = vmatpush.msrb.mxu2 %v1009_v37  ;;  %v1220_v37 = vld [vmem:[%s1269_s2] ss:$0 sm:$0xff] }
  0x60   : > { %730 = vmatmul.msk.f32.vlgmr.msrb.gmra.mxu3 %vm287_vm0, %v723_v61  ;;  %484 = vmatpush.msrb.mxu1 %v1123_v55 }
  0x61   : > { %319 = vmatmul.f32.gmra.mxu0 %v278_v62 }
  0x62   : > { %402 = vmatmul.f32.gmra.mxu2 %v712_v63  ;;  %559 = vmatpush.msrb.mxu0 %v1001_v36 }
  0x63   : > { %485 = vmatpush.msrb.mxu1 %v1133_v57 }
  0x64   : > { %486 = vmatmul.f32.vlgmr.msrb.gmra.mxu1 %v722_v0  ;;  %560 = vmatpush.msrb.mxu0 %v1018_v39 }
  0x65   : > { %750 = vmatpush.msra.mxu1 %v977_v32 }
  0x66   : > { %561 = vmatpush.msrb.mxu0 %v1028_v41 }
  0x67   : > { %751 = vmatpush.msra.mxu1 %v987_v34 }
  0x68   : > { %731 = vmatmul.msk.f32.gmra.mxu3 %vm287_vm0, %v725_v1  ;;  %562 = vmatpush.msrb.mxu0 %v1038_v42 }
  0x69   : > { %752 = vmatpush.msra.mxu1 %v1001_v36  ;;  %322 = vmatmul.f32.gmra.mxu0 %v280_v2 }
  0x6a   : > { %405 = vmatmul.f32.gmra.mxu2 %v714_v3  ;;  %563 = vmatpush.msrb.mxu0 %v1046_v43 }
  0x6b   : > { %753 = vmatpush.msra.mxu1 %v1018_v39 }
  0x6c   : > { %489 = vmatmul.f32.gmra.mxu1 %v724_v4  ;;  %564 = vmatpush.msrb.mxu0 %v1056_v45 }
  0x6d   : > { %754 = vmatpush.msra.mxu1 %v1028_v41 }
  0x6e   : > { %565 = vmatpush.msrb.mxu0 %v1065_v46 }
  0x6f   : > { %755 = vmatpush.msra.mxu1 %v1038_v42 }
  0x70   : > { %732 = vmatmul.msk.f32.gmra.mxu3 %vm287_vm0, %v727_v5  ;;  %566 = vmatpush.msrb.mxu0 %v1076_v48 }
  0x71   : > { %756 = vmatpush.msra.mxu1 %v1046_v43  ;;  %325 = vmatmul.f32.gmra.mxu0 %v282_v6 }
  0x72   : > { %408 = vmatmul.f32.gmra.mxu2 %v716_v7  ;;  %567 = vmatpush.msrb.mxu0 %v1085_v49 }
  0x73   : > { %757 = vmatpush.msra.mxu1 %v1056_v45 }
  0x74   : > { %492 = vmatmul.f32.gmra.mxu1 %v726_v8  ;;  %568 = vmatpush.msrb.mxu0 %v1095_v51 }
  0x75   : > { %758 = vmatpush.msra.mxu1 %v1065_v46 }
  0x76   : > { %569 = vmatpush.msrb.mxu0 %v1104_v52 }
  0x77   : > { %759 = vmatpush.msra.mxu1 %v1076_v48 }
  0x78   : > { %733 = vmatmul.msk.f32.gmra.mxu3 %vm287_vm0, %v729_v9  ;;  %570 = vmatpush.msrb.mxu0 %v1114_v54 }
  0x79   : > { %760 = vmatpush.msra.mxu1 %v1085_v49 }
  0x7a   : > { %571 = vmatpush.msrb.mxu0 %v1123_v55  ;;  %742 = vmatmul.msk.f32.vlgmr.msrb.gmra.mxu2 %vm287_vm0, %v735_v10 }
  0x7b   : > { %761 = vmatpush.msra.mxu1 %v1095_v51 }
  0x7c   : > { %495 = vmatmul.f32.gmra.mxu1 %v728_v11  ;;  %572 = vmatpush.msrb.mxu0 %v1133_v57 }
  0x7d   : > { %762 = vmatpush.msra.mxu1 %v1104_v52  ;;  %573 = vmatmul.f32.vlgmr.msrb.gmra.mxu0 %v734_v12 }
  0x7f   : > { %763 = vmatpush.msra.mxu1 %v1114_v54 }
  0x80   : > { %745 = vmatmul.msk.f32.vlgmr.msra.gmra.mxu3 %vm287_vm0, %v741_v13 }
  0x81   : > { %764 = vmatpush.msra.mxu1 %v1123_v55 }
  0x82   : > { %743 = vmatmul.msk.f32.gmra.mxu2 %vm287_vm0, %v737_v14 }
  0x83   : > { %765 = vmatpush.msra.mxu1 %v1133_v57 }
  0x84   : > { %582 = vmatmul.f32.vlgmr.msra.gmra.mxu1 %v740_v15 }
  0x85   : > { %576 = vmatmul.f32.gmra.mxu0 %v736_v16 }
  0x8a   : > { %744 = vmatmul.msk.f32.gmra.mxu2 %vm287_vm0, %v739_v17 }
  0x8d   : > { %579 = vmatmul.f32.gmra.mxu0 %v738_v18 }
  0xbe   : > { %v346_v19 = vpop.f32.mrf.mxu1 }
  0xc3   : > { %v429_v20 = vpop.f32.mrf.mxu3 }
  0xc7   : > { %v349_v21 = vpop.f32.mrf.mxu1 }
  0xcb   : > { %v432_v22 = vpop.f32.mrf.mxu3 }
  0xcf   : > { %v352_v23 = vpop.f32.mrf.mxu1 }
  0xd3   : > { %v435_v24 = vpop.f32.mrf.mxu3 }
  0xd6   : > { %v317_v25 = vpop.f32.mrf.mxu0 }
  0xd7   : > { %v318_v41 = vadd.f32 %v1220_v37, %v317_v25 }
  0xd8   : > { %v1215_v26 = vpop.f32.mrf.mxu1 }
  0xd9   : > { %v347_v46 = vadd.f32 %v346_v19, %v318_v41 }
  0xdb   : > { %v438_v27 = vpop.f32.mrf.mxu3 }
  0xdd   : > { %v400_v28 = vpop.f32.mrf.mxu2 }
  0xde   : > { %v320_v29 = vpop.f32.mrf.mxu0  ;;  %v401_v39 = vadd.f32 %v1220_v37, %v400_v28 }
  0xdf   : > { %v321_v48 = vadd.f32 %v1220_v37, %v320_v29 }
  0xe0   : > { %v430_v45 = vadd.f32 %v429_v20, %v401_v39 }
  0xe1   : > { %v487_v30 = vpop.f32.mrf.mxu1  ;;  %v350_v55 = vadd.f32 %v349_v21, %v321_v48 }
  0xe2   : > { %v488_v43 = vadd.f32 %v1220_v37, %v487_v30  ;;  %794 = vtanh.f32 %v430_v45 }
  0xe3   : > { %v516_v31 = vpop.f32.mrf.mxu3  ;;  %796 = vtanh.f32 %v347_v46 }
  0xe4   : > { %v517_v47 = vadd.f32 %v516_v31, %v488_v43 }
  0xe5   : > { %v403_v32 = vpop.f32.mrf.mxu2 }
  0xe6   : > { %v323_v33 = vpop.f32.mrf.mxu0  ;;  %v404_v50 = vadd.f32 %v1220_v37, %v403_v32  ;;  %798 = vtanh.f32 %v517_v47 }
  0xe7   : > { %v324_v58 = vadd.f32 %v1220_v37, %v323_v33 }
  0xe8   : > { %v433_v57 = vadd.f32 %v432_v22, %v404_v50  ;;  %v795_v61 = vpop.eup %794 }
  0xe9   : > { %v490_v34 = vpop.f32.mrf.mxu1  ;;  %v797_v63 = vpop.eup %796  ;;  %v353_v2 = vadd.f32 %v352_v23, %v324_v58 }
  0xea   : > { %v491_v53 = vadd.f32 %v1220_v37, %v490_v34  ;;  %v445_v6 = vadd.f32 %v797_v63, %v795_v61 }
  0xeb   : > { %v519_v35 = vpop.f32.mrf.mxu3 }
  0xec   : > { %v520_v62 = vadd.f32 %v519_v35, %v491_v53  ;;  %v799_v1 = vpop.eup %798 }
  0xed   : > { %v406_v36 = vpop.f32.mrf.mxu2  ;;  %v532_v11 = vadd.f32 %v799_v1, %v445_v6 }
  0xee   : > { %v326_v40 = vpop.f32.mrf.mxu0  ;;  %v407_v60 = vadd.f32 %v1220_v37, %v406_v36 }
  0xef   : > { %v327_v3 = vadd.f32 %v1220_v37, %v326_v40 }
  0xf0   : > { %v436_v7 = vadd.f32 %v435_v24, %v407_v60 }
  0xf1   : > { %v493_v38 = vpop.f32.mrf.mxu1  ;;  %v356_v16 = vadd.f32 %v1215_v26, %v327_v3 }
  0xf2   : > { %v494_v10 = vadd.f32 %v1220_v37, %v493_v38 }
  0xf3   : > { %v522_v42 = vpop.f32.mrf.mxu3 }
  0xf4   : > { %v523_v23 = vadd.f32 %v522_v42, %v494_v10 }
  0xf5   : > { %v409_v44 = vpop.f32.mrf.mxu2 }
  0xf6   : > { %v410_v0 = vadd.f32 %v1220_v37, %v409_v44 }
  0xf8   : > { %v439_v12 = vadd.f32 %v438_v27, %v410_v0 }
  0xf9   : > { %v496_v49 = vpop.f32.mrf.mxu1 }
  0xfa   : > { %v574_v51 = vpop.f32.mrf.mxu0  ;;  %v497_v8 = vadd.f32 %v1220_v37, %v496_v49 }
  0xfb   : > { %v575_v52 = vadd.f32 %v1220_v37, %v574_v51  ;;  %v525_v54 = vpop.f32.mrf.mxu3 }
  0xfc   : > { %v526_v20 = vadd.f32 %v525_v54, %v497_v8 }
  0xfd   : > { %v603_v56 = vpop.f32.mrf.mxu2 }
  0xfe   : > { %v604_v59 = vadd.f32 %v603_v56, %v575_v52 }
 0x100   : > { %800 = vtanh.f32 %v604_v59 }
 0x101   : > { %802 = vtanh.f32 %v350_v55  ;;  %v583_v4 = vpop.f32.mrf.mxu1 }
 0x102   : > { %804 = vtanh.f32 %v433_v57  ;;  %v577_v5 = vpop.f32.mrf.mxu0  ;;  %v584_v13 = vadd.f32 %v1220_v37, %v583_v4 }
 0x103   : > { %v578_v9 = vadd.f32 %v1220_v37, %v577_v5  ;;  %806 = vtanh.f32 %v520_v62  ;;  %v612_v17 = vpop.f32.mrf.mxu3 }
 0x104   : > { %808 = vtanh.f32 %v353_v2  ;;  %v613_v25 = vadd.f32 %v612_v17, %v584_v13 }
 0x105   : > { %v606_v14 = vpop.f32.mrf.mxu2  ;;  %810 = vtanh.f32 %v436_v7 }
 0x106   : > { %v801_v15 = vpop.eup %800  ;;  %v607_v18 = vadd.f32 %v606_v14, %v578_v9 }
 0x107   : > { %v803_v19 = vpop.eup %802  ;;  %v619_v21 = vadd.f32 %v801_v15, %v532_v11 }
 0x108   : > { %v805_v22 = vpop.eup %804  ;;  %812 = vtanh.f32 %v607_v18 }
 0x109   : > { %814 = vtanh.f32 %v439_v12  ;;  %v623_v24 = vmul.f32 0.25, %v619_v21  ;;  %v807_v26 = vpop.eup %806  ;;  %v446_v28 = vadd.f32 %v805_v22, %v803_v19 }
 0x10a   : > { %816 = vtanh.f32 %v356_v16  ;;  %v580_v27 = vpop.f32.mrf.mxu0  ;;  %v809_v30 = vpop.eup %808 }
 0x10b   : > { %818 = vtanh.f32 %v526_v20  ;;  %628 = vst.msk [vmem:[%s1246_s28] sm:$0xff] %vm627_vm1, %v623_v24  ;;  %v581_v29 = vadd.f32 %v1220_v37, %v580_v27  ;;  %v811_v31 = vpop.eup %810  ;;  %v533_v32 = vadd.f32 %v807_v26, %v446_v28 }
 0x10c   : > { %820 = vtanh.f32 %v523_v23  ;;  %v447_v44 = vadd.f32 %v811_v31, %v809_v30 }
 0x10d   : > { %822 = vtanh.f32 %v613_v25  ;;  %v609_v33 = vpop.f32.mrf.mxu2 }
 0x10e   : > { %v813_v34 = vpop.eup %812  ;;  %v610_v35 = vadd.f32 %v609_v33, %v581_v29 }
 0x10f   : > { %v815_v36 = vpop.eup %814  ;;  %v620_v38 = vadd.f32 %v813_v34, %v533_v32 }
 0x110   : > { %v817_v39 = vpop.eup %816  ;;  %824 = vtanh.f32 %v610_v35 }
 0x111   : > { %v819_v40 = vpop.eup %818  ;;  %v624_v41 = vmul.f32 0.25, %v620_v38  ;;  %v448_v43 = vadd.f32 %v817_v39, %v815_v36 }
 0x112   : > { %v821_v42 = vpop.eup %820 }
 0x113   : > { %v823_v37 = vpop.eup %822  ;;  %629 = vst.msk [vmem:[%s1246_s28 + $0x8] sm:$0xff] %vm627_vm1, %v624_v41  ;;  %v535_v45 = vadd.f32 %v819_v40, %v448_v43  ;;  %v534_v46 = vadd.f32 %v821_v42, %v447_v44 }
 0x115   : > { %v622_v48 = vadd.f32 %v823_v37, %v535_v45 }
 0x116   : > { %v825_v47 = vpop.eup %824 }
 0x117   : > { %v621_v49 = vadd.f32 %v825_v47, %v534_v46  ;;  %v626_v51 = vmul.f32 0.25, %v622_v48 }
 0x119   : > { %v625_v50 = vmul.f32 0.25, %v621_v49  ;;  %631 = vst.msk [vmem:[%s1246_s28 + $0x18] sm:$0xff] %vm627_vm1, %v626_v51 }
 0x11b   : > { %630 = vst.msk [vmem:[%s1246_s28 + $0x10] sm:$0xff] %vm627_vm1, %v625_v50 }
 0x11c PF: > { %p10_p9 = scmp.ge.s32.totalorder %s887_s16, 4   ;;  %s1271_s12 = smov %s844_s13 }
 0x11d   : > { %s1272_s13 = smov %s896_s19  ;;  %s1273_s14 = smov %s887_s16 }
 0x11e   :  { %12 = sbr.rel (!%p10_p9) target bundleno = 2 (0x2), region = 93 }

// kernel: lenet5_forward.5
= control target key start
LH: loop header
LB: loop body
LE: loop exit
PB: predicated region body
PF: predicated region fallthrough
CT: control target
= control target key end

     0   :  { %vm84_vm0 = vcmask 130048   ;;  %s575_s1 = inlined_call_operand.vmem [shape: f32[400,128], index: 1, kind: input, shape index: {}]   ;;  %s576_s0 = inlined_call_operand.vmem [shape: f32[8,400], index: 0, kind: input, shape index: {}]   ;;  %s577_s3 = inlined_call_operand.vmem [shape: f32[128,128], index: 3, kind: input, shape index: {}]   ;;  %s578_s2 = inlined_call_operand.vmem [shape: f32[1,128], index: 2, kind: input, shape index: {}]   ;;  %s579_s4 = inlined_call_operand.vmem [shape: f32[1,128], index: 4, kind: input, shape index: {}]   ;;  %s580_s5 = inlined_call_operand.vmem [shape: f32[128,16], index: 5, kind: input, shape index: {}]   ;;  %s581_s6 = inlined_call_operand.vmem [shape: f32[1,16], index: 6, kind: input, shape index: {}]   ;;  %s582_s7 = inlined_call_operand.vmem [shape: f32[8,16], index: 7, kind: output, shape index: {}]  }
   0x1   :  { %v77_v0 = vld [vmem:[%s575_s1 + $0x178] sm:$0xff]  ;;  %v76_v2 = vld [vmem:[%s575_s1 + $0x170] sm:$0xff]  ;;  %v75_v5 = vld [vmem:[%s575_s1 + $0x168] sm:$0xff] }
   0x2   :  { %v45_v1 = vld [vmem:[%s575_s1 + $0x78] sm:$0xff]  ;;  %128 = vmatpush.msra.mxu2 %v77_v0  ;;  %v44_v3 = vld [vmem:[%s575_s1 + $0x70] sm:$0xff]  ;;  %v43_v6 = vld [vmem:[%s575_s1 + $0x68] sm:$0xff] }
   0x3   :  { %88 = vmatpush.msra.mxu0 %v45_v1  ;;  %v61_v4 = vld [vmem:[%s575_s1 + $0xf8] sm:$0xff]  ;;  %v60_v7 = vld [vmem:[%s575_s1 + $0xf0] sm:$0xff]  ;;  %v59_v8 = vld [vmem:[%s575_s1 + $0xe8] sm:$0xff] }
   0x4   :  { %108 = vmatpush.msra.mxu1 %v61_v4  ;;  %129 = vmatpush.msra.mxu2 %v76_v2  ;;  %v74_v9 = vld [vmem:[%s575_s1 + $0x160] sm:$0xff]  ;;  %v73_v12 = vld [vmem:[%s575_s1 + $0x158] sm:$0xff]  ;;  %v72_v15 = vld [vmem:[%s575_s1 + $0x150] sm:$0xff] }
   0x5   :  { %89 = vmatpush.msra.mxu0 %v44_v3  ;;  %v42_v10 = vld [vmem:[%s575_s1 + $0x60] sm:$0xff]  ;;  %v41_v13 = vld [vmem:[%s575_s1 + $0x58] sm:$0xff]  ;;  %v40_v16 = vld [vmem:[%s575_s1 + $0x50] sm:$0xff] }
   0x6   :  { %109 = vmatpush.msra.mxu1 %v60_v7  ;;  %130 = vmatpush.msra.mxu2 %v75_v5  ;;  %v58_v11 = vld [vmem:[%s575_s1 + $0xe0] sm:$0xff]  ;;  %v57_v14 = vld [vmem:[%s575_s1 + $0xd8] sm:$0xff]  ;;  %v56_v17 = vld [vmem:[%s575_s1 + $0xd0] sm:$0xff] }
   0x7   :  { %90 = vmatpush.msra.mxu0 %v43_v6  ;;  %v71_v18 = vld [vmem:[%s575_s1 + $0x148] sm:$0xff]  ;;  %v70_v21 = vld [vmem:[%s575_s1 + $0x140] sm:$0xff]  ;;  %v69_v24 = vld [vmem:[%s575_s1 + $0x138] sm:$0xff] }
   0x8   :  { %110 = vmatpush.msra.mxu1 %v59_v8  ;;  %131 = vmatpush.msra.mxu2 %v74_v9  ;;  %v39_v19 = vld [vmem:[%s575_s1 + $0x48] sm:$0xff]  ;;  %v38_v22 = vld [vmem:[%s575_s1 + $0x40] sm:$0xff]  ;;  %v37_v25 = vld [vmem:[%s575_s1 + $0x38] sm:$0xff] }
   0x9   :  { %91 = vmatpush.msra.mxu0 %v42_v10  ;;  %v55_v20 = vld [vmem:[%s575_s1 + $0xc8] sm:$0xff]  ;;  %v54_v23 = vld [vmem:[%s575_s1 + $0xc0] sm:$0xff]  ;;  %v53_v26 = vld [vmem:[%s575_s1 + $0xb8] sm:$0xff] }
   0xa   :  { %111 = vmatpush.msra.mxu1 %v58_v11  ;;  %132 = vmatpush.msra.mxu2 %v73_v12  ;;  %v79_v27 = vld [vmem:[%s575_s1 + $0x188] sm:$0xff]  ;;  %v68_v28 = vld [vmem:[%s575_s1 + $0x130] sm:$0xff]  ;;  %v78_v30 = vld [vmem:[%s575_s1 + $0x180] sm:$0xff] }
   0xb   :  { %92 = vmatpush.msra.mxu0 %v41_v13  ;;  %v36_v29 = vld [vmem:[%s575_s1 + $0x30] sm:$0xff]  ;;  %162 = vmatpush.msra.mxu3 %v79_v27  ;;  %v29_v32 = vld [vmem:[%s576_s0 + $0x18] sm:$0xff]  ;;  %v67_v33 = vld [vmem:[%s575_s1 + $0x128] sm:$0xff] }
   0xc   :  { %112 = vmatpush.msra.mxu1 %v57_v14  ;;  %133 = vmatpush.msra.mxu2 %v72_v15  ;;  %v52_v31 = vld [vmem:[%s575_s1 + $0xb0] sm:$0xff]  ;;  %v35_v34 = vld [vmem:[%s575_s1 + $0x28] sm:$0xff]  ;;  %v184_v36 = vld [vmem:[%s577_s3 + $0x78] sm:$0xff] }
   0xd   :  { %93 = vmatpush.msra.mxu0 %v40_v16  ;;  %163 = vmatpush.msra.mxu3 %v78_v30  ;;  %v51_v35 = vld [vmem:[%s575_s1 + $0xa8] sm:$0xff]  ;;  %v66_v37 = vld [vmem:[%s575_s1 + $0x120] sm:$0xff]  ;;  %v183_v40 = vld [vmem:[%s577_s3 + $0x70] sm:$0xff] }
   0xe   :  { %113 = vmatpush.msra.mxu1 %v56_v17  ;;  %134 = vmatpush.msra.mxu2 %v71_v18  ;;  %v34_v38 = vld [vmem:[%s575_s1 + $0x20] sm:$0xff]  ;;  %v65_v41 = vld [vmem:[%s575_s1 + $0x118] sm:$0xff]  ;;  %v182_v44 = vld [vmem:[%s577_s3 + $0x68] sm:$0xff] }
   0xf   :  { %94 = vmatpush.msra.mxu0 %v39_v19  ;;  %255 = vmatmul.msk.f32.vlgmr.msra.gmra.mxu3 %vm84_vm0, %v29_v32  ;;  %v50_v39 = vld [vmem:[%s575_s1 + $0xa0] sm:$0xff]  ;;  %v33_v42 = vld [vmem:[%s575_s1 + $0x18] sm:$0xff]  ;;  %v64_v45 = vld [vmem:[%s575_s1 + $0x110] sm:$0xff] }
  0x10   :  { %114 = vmatpush.msra.mxu1 %v55_v20  ;;  %135 = vmatpush.msra.mxu2 %v70_v21  ;;  %v49_v43 = vld [vmem:[%s575_s1 + $0x98] sm:$0xff]  ;;  %v32_v46 = vld [vmem:[%s575_s1 + $0x10] sm:$0xff]  ;;  %v181_v48 = vld [vmem:[%s577_s3 + $0x60] sm:$0xff] }
  0x11   :  { %95 = vmatpush.msra.mxu0 %v38_v22  ;;  %189 = vmatpush.msrb.mxu3 %v184_v36  ;;  %v48_v47 = vld [vmem:[%s575_s1 + $0x90] sm:$0xff]  ;;  %v63_v49 = vld [vmem:[%s575_s1 + $0x108] sm:$0xff]  ;;  %v180_v52 = vld [vmem:[%s577_s3 + $0x58] sm:$0xff] }
  0x12   :  { %115 = vmatpush.msra.mxu1 %v54_v23  ;;  %136 = vmatpush.msra.mxu2 %v69_v24  ;;  %v31_v50 = vld [vmem:[%s575_s1 + $0x8] sm:$0xff]  ;;  %v62_v53 = vld [vmem:[%s575_s1 + $0x100] sm:$0xff]  ;;  %v28_v55 = vld [vmem:[%s576_s0 + $0x10] sm:$0xff] }
  0x13   :  { %96 = vmatpush.msra.mxu0 %v37_v25  ;;  %190 = vmatpush.msrb.mxu3 %v183_v40  ;;  %v47_v51 = vld [vmem:[%s575_s1 + $0x88] sm:$0xff]  ;;  %v30_v54 = vld [vmem:[%s575_s1] sm:$0xff]  ;;  %v179_v58 = vld [vmem:[%s577_s3 + $0x50] sm:$0xff] }
  0x14   :  { %116 = vmatpush.msra.mxu1 %v53_v26  ;;  %137 = vmatpush.msra.mxu2 %v68_v28  ;;  %v26_v56 = vld [vmem:[%s576_s0] sm:$0xff]  ;;  %v27_v59 = vld [vmem:[%s576_s0 + $0x8] sm:$0xff]  ;;  %v176_v62 = vld [vmem:[%s577_s3 + $0x38] sm:$0xff] }
  0x15   :  { %97 = vmatpush.msra.mxu0 %v36_v29  ;;  %191 = vmatpush.msrb.mxu3 %v182_v44  ;;  %v46_v57 = vld [vmem:[%s575_s1 + $0x80] sm:$0xff]  ;;  %v178_v60 = vld [vmem:[%s577_s3 + $0x48] sm:$0xff]  ;;  %v175_v63 = vld [vmem:[%s577_s3 + $0x30] sm:$0xff] }
  0x16   :  { %117 = vmatpush.msra.mxu1 %v52_v31  ;;  %138 = vmatpush.msra.mxu2 %v67_v33  ;;  %v177_v61 = vld [vmem:[%s577_s3 + $0x40] sm:$0xff]  ;;  %v174_v0 = vld [vmem:[%s577_s3 + $0x28] sm:$0xff]  ;;  %v172_v2 = vld [vmem:[%s577_s3 + $0x18] sm:$0xff] }
  0x17   :  { %98 = vmatpush.msra.mxu0 %v35_v34  ;;  %192 = vmatpush.msrb.mxu3 %v181_v48  ;;  %v173_v1 = vld [vmem:[%s577_s3 + $0x20] sm:$0xff]  ;;  %v171_v3 = vld [vmem:[%s577_s3 + $0x10] sm:$0xff]  ;;  %v170_v4 = vld [vmem:[%s577_s3 + $0x8] sm:$0xff] }
  0x18   :  { %118 = vmatpush.msra.mxu1 %v51_v35  ;;  %139 = vmatpush.msra.mxu2 %v66_v37  ;;  %v169_v5 = vld [vmem:[%s577_s3] sm:$0xff]  ;;  %v225_v6 = vld [vmem:[%s580_s5 + $0x78] sm:$0xff]  ;;  %v224_v7 = vld [vmem:[%s580_s5 + $0x70] sm:$0xff] }
  0x19   :  { %99 = vmatpush.msra.mxu0 %v34_v38  ;;  %193 = vmatpush.msrb.mxu3 %v180_v52  ;;  %v223_v8 = vld [vmem:[%s580_s5 + $0x68] sm:$0xff]  ;;  %v222_v9 = vld [vmem:[%s580_s5 + $0x60] sm:$0xff]  ;;  %v221_v10 = vld [vmem:[%s580_s5 + $0x58] sm:$0xff] }
  0x1a   :  { %119 = vmatpush.msra.mxu1 %v50_v39  ;;  %140 = vmatpush.msra.mxu2 %v65_v41  ;;  %v220_v11 = vld [vmem:[%s580_s5 + $0x50] sm:$0xff]  ;;  %v219_v12 = vld [vmem:[%s580_s5 + $0x48] sm:$0xff]  ;;  %v256_v13 = vld [vmem:[%s578_s2] ss:$0 sm:$0xff] }
  0x1b   :  { %100 = vmatpush.msra.mxu0 %v33_v42  ;;  %194 = vmatpush.msrb.mxu3 %v179_v58  ;;  %v218_v14 = vld [vmem:[%s580_s5 + $0x40] sm:$0xff]  ;;  %v217_v16 = vld [vmem:[%s580_s5 + $0x38] sm:$0xff]  ;;  %v216_v19 = vld [vmem:[%s580_s5 + $0x30] sm:$0xff] }
  0x1c   :  { %120 = vmatpush.msra.mxu1 %v49_v43  ;;  %141 = vmatpush.msra.mxu2 %v64_v45  ;;  %v215_v21 = vld [vmem:[%s580_s5 + $0x28] sm:$0xff]  ;;  %v214_v27 = vld [vmem:[%s580_s5 + $0x20] sm:$0xff]  ;;  %v213_v28 = vld [vmem:[%s580_s5 + $0x18] sm:$0xff] }
  0x1d   :  { %101 = vmatpush.msra.mxu0 %v32_v46  ;;  %195 = vmatpush.msrb.mxu3 %v178_v60  ;;  %v212_v29 = vld [vmem:[%s580_s5 + $0x10] sm:$0xff]  ;;  %v211_v30 = vld [vmem:[%s580_s5 + $0x8] sm:$0xff]  ;;  %v210_v31 = vld [vmem:[%s580_s5] sm:$0xff] }
  0x1e   :  { %121 = vmatpush.msra.mxu1 %v48_v47  ;;  %142 = vmatpush.msra.mxu2 %v63_v49  ;;  %v257_v32 = vld [vmem:[%s579_s4] ss:$0 sm:$0xff] }
  0x1f   :  { %102 = vmatpush.msra.mxu0 %v31_v50  ;;  %196 = vmatpush.msrb.mxu3 %v177_v61  ;;  %v258_v36 = vld [vmem:[%s581_s6] ss:$0 sm:$0xff] }
  0x20   :  { %122 = vmatpush.msra.mxu1 %v47_v51  ;;  %143 = vmatpush.msra.mxu2 %v62_v53 }
  0x21   :  { %103 = vmatpush.msra.mxu0 %v30_v54  ;;  %144 = vmatmul.f32.vlgmr.msra.gmra.mxu2 %v28_v55 }
  0x22   :  { %104 = vmatmul.f32.vlgmr.msra.gmra.mxu0 %v26_v56  ;;  %123 = vmatpush.msra.mxu1 %v46_v57 }
  0x23   :  { %124 = vmatmul.f32.vlgmr.msra.gmra.mxu1 %v27_v59  ;;  %197 = vmatpush.msrb.mxu3 %v176_v62 }
  0x24   :  { %230 = vmatpush.msrb.mxu0 %v225_v6 }
  0x25   :  { %198 = vmatpush.msrb.mxu3 %v175_v63 }
  0x26   :  { %231 = vmatpush.msrb.mxu0 %v224_v7 }
  0x27   :  { %199 = vmatpush.msrb.mxu3 %v174_v0 }
  0x28   :  { %232 = vmatpush.msrb.mxu0 %v223_v8 }
  0x29   :  { %200 = vmatpush.msrb.mxu3 %v173_v1 }
  0x2a   :  { %233 = vmatpush.msrb.mxu0 %v222_v9 }
  0x2b   :  { %201 = vmatpush.msrb.mxu3 %v172_v2 }
  0x2c   :  { %234 = vmatpush.msrb.mxu0 %v221_v10 }
  0x2d   :  { %202 = vmatpush.msrb.mxu3 %v171_v3 }
  0x2e   :  { %235 = vmatpush.msrb.mxu0 %v220_v11 }
  0x2f   :  { %203 = vmatpush.msrb.mxu3 %v170_v4 }
  0x30   :  { %236 = vmatpush.msrb.mxu0 %v219_v12 }
  0x31   :  { %204 = vmatpush.msrb.mxu3 %v169_v5 }
  0x32   :  { %237 = vmatpush.msrb.mxu0 %v218_v14 }
  0x34   :  { %238 = vmatpush.msrb.mxu0 %v217_v16 }
  0x36   :  { %239 = vmatpush.msrb.mxu0 %v216_v19 }
  0x38   :  { %240 = vmatpush.msrb.mxu0 %v215_v21 }
  0x3a   :  { %241 = vmatpush.msrb.mxu0 %v214_v27 }
  0x3c   :  { %242 = vmatpush.msrb.mxu0 %v213_v28 }
  0x3e   :  { %243 = vmatpush.msrb.mxu0 %v212_v29 }
  0x40   :  { %244 = vmatpush.msrb.mxu0 %v211_v30 }
  0x42   :  { %245 = vmatpush.msrb.mxu0 %v210_v31 }
  0x92   :  { %v165_v23 = vpop.f32.mrf.mxu3 }
  0x9f   :  { %v105_v15 = vpop.f32.mrf.mxu0 }
  0xa0   :  { %v106_v17 = vadd.f32 %v256_v13, %v105_v15  ;;  %v125_v18 = vpop.f32.mrf.mxu1 }
  0xa2   :  { %v126_v20 = vadd.f32 %v125_v18, %v106_v17 }
  0xa4   :  { %v145_v22 = vpop.f32.mrf.mxu2 }
  0xa5   :  { %v146_v24 = vadd.f32 %v145_v22, %v126_v20 }
  0xa7   :  { %v166_v25 = vadd.f32 %v165_v23, %v146_v24 }
  0xa9   :  { %259 = vtanh.f32 %v166_v25 }
  0xaf   :  { %v260_v26 = vpop.eup %259 }
  0xb0   :  { %205 = vmatmul.f32.vlgmr.msrb.gmra.mxu3 %v260_v26 }
 0x133   :  { %v206_v33 = vpop.f32.mrf.mxu3 }
 0x134   :  { %v207_v34 = vadd.f32 %v257_v32, %v206_v33 }
 0x136   :  { %261 = vtanh.f32 %v207_v34 }
 0x13c   :  { %v262_v35 = vpop.eup %261 }
 0x13d   :  { %246 = vmatmul.f32.vlgmr.msrb.gmra.mxu0 %v262_v35 }
 0x1ba   :  { %v247_v37 = vpop.f32.mrf.mxu0 }
 0x1bb   :  { %v248_v38 = vadd.f32 %v258_v36, %v247_v37 }
 0x1bd   :  { %250 = vst.msk [vmem:[%s582_s7] sm:$0xff] %vm84_vm0, %v248_v38 }

</bundles_post_ra>
